<compile_context>
chip_gen: v7x
topology: tpu7x:2x2x1
jax: 0.10.0
libtpu: 0.0.40
codegen_flags: <defaults>
</compile_context>

<pallas_src>
import math

import jax
import jax.numpy as jnp
from jax.experimental import pallas as pl
from jax.experimental.pallas import tpu as pltpu

BN_EPS = 1e-5


def _round_up(x: int, m: int) -> int:
    return (x + m - 1) // m * m


# ---------------------------------------------------------------------------
# Per-chip tiling knobs (resolved once at import time).
# ---------------------------------------------------------------------------
def _tpu_vmem_capacity_bytes() -> int:
    try:
        return int(pltpu.get_tpu_info().vmem_capacity_bytes)
    except Exception:
        return 64 * 1024 * 1024  # conservative default (v7x-sized)


_VMEM_CAP = _tpu_vmem_capacity_bytes()
if _VMEM_CAP >= 96 * 1024 * 1024:        # v5e / v6e: 128 MiB physical VMEM
    _TM_CAP = 1024
    _VMEM_LIMIT = 64 * 1024 * 1024
else:                                    # v7x: 64 MiB physical (32 MiB scoped)
    _TM_CAP = 512
    _VMEM_LIMIT = 32 * 1024 * 1024
_TILE_BUDGET = (3 * _VMEM_LIMIT) // 4    # headroom for pipeline bookkeeping


# ---------------------------------------------------------------------------
# Pallas kernels
# ---------------------------------------------------------------------------
def _matmul_bias_relu_kernel(p_ref, w_ref, b_ref, o_ref):
    """out = relu(patches @ W_bnfolded + bias); full-K block, f32 MXU accum."""
    acc = jnp.dot(p_ref[...], w_ref[...], preferred_element_type=jnp.float32)
    o_ref[...] = jnp.maximum(acc + b_ref[...], 0.0).astype(o_ref.dtype)


def _maxpool9_kernel(ph_ref, o_ref):
    """3x3/s2 max pool from 4 stride-2 parity planes (VPU, 9 shifted views).

    ph_ref: (4, 1, Hc, Wc, C) planes [row-even/col-even, e/o, o/e, o/o]
    o_ref : (1, Hout, Wout, C)
    """
    hout = o_ref.shape[1]
    wout = o_ref.shape[2]

    def tap(p, dh, dw):
        return ph_ref[p, 0, pl.ds(dh, hout), pl.ds(dw, wout), :]

    acc = tap(0, 0, 0)
    for (p, dh, dw) in ((0, 0, 1), (0, 1, 0), (0, 1, 1),   # ee plane
                        (1, 0, 0), (1, 1, 0),              # eo plane
                        (2, 0, 0), (2, 0, 1),              # oe plane
                        (3, 0, 0)):                        # oo plane
        acc = jnp.maximum(acc, tap(p, dh, dw))
    o_ref[0] = acc


# ---------------------------------------------------------------------------
# Wrappers (glue: im2col / padding / tiling decisions)
# ---------------------------------------------------------------------------
def _im2col(x_nhwc, kh, kw, stride, padding):
    if padding > 0:
        x_nhwc = jnp.pad(
            x_nhwc, ((0, 0), (padding, padding), (padding, padding), (0, 0))
        )
    n, h, w, c = x_nhwc.shape
    hout = (h - kh) // stride + 1
    wout = (w - kw) // stride + 1
    cols = []
    for i in range(kh):
        for j in range(kw):
            cols.append(
                jax.lax.slice(
                    x_nhwc,
                    (0, i, j, 0),
                    (n, i + (hout - 1) * stride + 1, j + (wout - 1) * stride + 1, c),
                    (1, stride, stride, 1),
                )
            )
    # (N, Hout, Wout, KH*KW, C) -> (N*Hout*Wout, KH*KW*C)
    patches = jnp.stack(cols, axis=3).reshape(n * hout * wout, kh * kw * c)
    return patches, (n, hout, wout)


def _pick_tm(m, kp, np_, out_itemsize):
    """TM: as large as the budget allows, but keep >= 2 M-blocks (megacore)."""
    tm = min(_TM_CAP, _round_up(max(8, -(-m // 2)), 8))

    def vmem_bytes(t):
        # double-buffered patch + out blocks; weights/bias resident (x2 bufs)
        return 2 * (t * kp * 2 + t * np_ * out_itemsize + kp * np_ * 2 + np_ * 4)

    while tm > 8 and vmem_bytes(tm) > _TILE_BUDGET:
        tm = max(8, _round_up(tm // 2, 8))
    return tm


def conv_bn_relu(x_nhwc, w_oihw, bn_scale, bn_bias, *, stride=1, padding=0,
                 keep_padded_cout=False, out_dtype=jnp.float32):
    # TODO(synk): implicit-GEMM conv (stream NHWC row tiles with a halo and
    # accumulate 9 shifted dots in VMEM) to remove the im2col HBM replication.
    cout, cin, kh, kw = w_oihw.shape
    if x_nhwc.shape[-1] != cin:
        # Previous conv in the chain emitted zero-padded output lanes; slice
        # back to the true channel count so K is NOT inflated (the slice fuses
        # into the im2col strided slices, it is not an extra pass).
        x_nhwc = x_nhwc[..., :cin]

    # bf16 operands for the MXU (f32 accumulation in-kernel). Casting before
    # im2col also halves the replicated-patch HBM traffic.
    patches, (n, hout, wout) = _im2col(x_nhwc.astype(jnp.bfloat16), kh, kw,
                                       stride, padding)
    m, k = patches.shape

    # Fold BN scale into the weights (inference BN => exact).
    wmat = jnp.transpose(w_oihw, (2, 3, 1, 0)).reshape(kh * kw * cin, cout)
    wmat = wmat * bn_scale[None, :]

    np_ = _round_up(cout, 128)           # lane-dense output / weight columns
    kp = _round_up(k, 128)               # keep contraction 128-aligned
    out_itemsize = 2 if out_dtype == jnp.bfloat16 else 4
    tm = _pick_tm(m, kp, np_, out_itemsize)
    mp = _round_up(m, tm)

    patches_p = jnp.pad(patches, ((0, mp - m), (0, kp - k)))
    w_p = jnp.pad(wmat, ((0, kp - k), (0, np_ - cout))).astype(jnp.bfloat16)
    b_p = jnp.pad(bn_bias, (0, np_ - cout)).reshape(1, np_).astype(jnp.float32)

    grid = (mp // tm,)                   # single M axis; K collapsed, N full

    out = pl.pallas_call(
        _matmul_bias_relu_kernel,
        out_shape=jax.ShapeDtypeStruct((mp, np_), out_dtype),
        grid=grid,
        in_specs=[
            pl.BlockSpec((tm, kp), lambda i: (i, 0)),    # patches: streamed once
            pl.BlockSpec((kp, np_), lambda i: (0, 0)),   # weights: resident
            pl.BlockSpec((1, np_), lambda i: (0, 0)),    # bias: resident
        ],
        out_specs=pl.BlockSpec((tm, np_), lambda i: (i, 0)),
        compiler_params=pltpu.CompilerParams(
            dimension_semantics=("parallel",),
            vmem_limit_bytes=_VMEM_LIMIT,
        ),
        cost_estimate=pl.CostEstimate(
            flops=2 * mp * kp * np_,
            transcendentals=0,
            bytes_accessed=mp * kp * 2 + kp * np_ * 2 + np_ * 4
            + mp * np_ * out_itemsize,
        ),
    )(patches_p, w_p, b_p)

    out = out[:m]
    if keep_padded_cout:
        # Padded lanes are exactly 0 (zero weight cols + zero bias + ReLU).
        return out.reshape(n, hout, wout, np_)
    return out[:, :cout].reshape(n, hout, wout, cout)


def maxpool_3x3_s2(x_nhwc):
    n, h, w, c = x_nhwc.shape
    hout = (h - 3) // 2 + 1
    wout = (w - 3) // 2 + 1
    hc = (h + 1) // 2
    wc = (w + 1) // 2

    xp = x_nhwc
    if 2 * hc != h or 2 * wc != w:       # pad odd spatial dims with -max
        xp = jnp.pad(x_nhwc, ((0, 0), (0, 2 * hc - h), (0, 2 * wc - w), (0, 0)),
                     constant_values=jnp.finfo(x_nhwc.dtype).min)

    # Four stride-2 parity planes (~1x input bytes total, no 9x replication).
    phases = jnp.stack(
        [xp[:, 0::2, 0::2, :],           # row even, col even
         xp[:, 0::2, 1::2, :],           # row even, col odd
         xp[:, 1::2, 0::2, :],           # row odd,  col even
         xp[:, 1::2, 1::2, :]],          # row odd,  col odd
        axis=0)                          # (4, N, Hc, Wc, C)

    return pl.pallas_call(
        _maxpool9_kernel,
        out_shape=jax.ShapeDtypeStruct((n, hout, wout, c), x_nhwc.dtype),
        grid=(n,),
        in_specs=[pl.BlockSpec((4, 1, hc, wc, c), lambda i: (0, i, 0, 0, 0))],
        out_specs=pl.BlockSpec((1, hout, wout, c), lambda i: (i, 0, 0, 0)),
        compiler_params=pltpu.CompilerParams(
            dimension_semantics=("parallel",),
            vmem_limit_bytes=_VMEM_LIMIT,
        ),
        cost_estimate=pl.CostEstimate(
            flops=8 * n * hout * wout * c,
            transcendentals=0,
            bytes_accessed=4 * n * hc * wc * c * 4 + n * hout * wout * c * 4,
        ),
    )(phases)


# ---------------------------------------------------------------------------
# Parameter init (deterministic, matches shapes of the PyTorch module)
# ---------------------------------------------------------------------------
def _trunc_normal(key, shape, stddev=0.1):
    return jax.random.truncated_normal(key, -2.0, 2.0, shape, jnp.float32) * stddev


def init_block_b_params(key, in_channels):
    ks = jax.random.split(key, 4)
    bn_scale = lambda c: jnp.full((c,), 1.0 / math.sqrt(1.0 + BN_EPS), jnp.float32)
    bn_bias = lambda c: jnp.zeros((c,), jnp.float32)
    return {
        "b3_w": _trunc_normal(ks[0], (384, in_channels, 3, 3)),
        "b3_s": bn_scale(384), "b3_b": bn_bias(384),
        "b33_w1": _trunc_normal(ks[1], (64, in_channels, 1, 1)),
        "b33_s1": bn_scale(64), "b33_b1": bn_bias(64),
        "b33_w2": _trunc_normal(ks[2], (96, 64, 3, 3)),
        "b33_s2": bn_scale(96), "b33_b2": bn_bias(96),
        "b33_w3": _trunc_normal(ks[3], (96, 96, 3, 3)),
        "b33_s3": bn_scale(96), "b33_b3": bn_bias(96),
    }


# ---------------------------------------------------------------------------
# _BlockB forward
# ---------------------------------------------------------------------------
def block_b_forward(x_nchw, p):
    x = jnp.transpose(x_nchw, (0, 2, 3, 1))  # NCHW -> NHWC

    # branch_3x3
    b1 = conv_bn_relu(x, p["b3_w"], p["b3_s"], p["b3_b"],
                      stride=2, padding=0, out_dtype=jnp.float32)

    # branch_3x3_3x3: intermediates are bf16 with 128 padded output lanes
    # (lane-dense stores); inputs are sliced back to true channels per conv.
    b2 = conv_bn_relu(x, p["b33_w1"], p["b33_s1"], p["b33_b1"],
                      stride=1, padding=0, keep_padded_cout=True,
                      out_dtype=jnp.bfloat16)
    b2 = conv_bn_relu(b2, p["b33_w2"], p["b33_s2"], p["b33_b2"],
                      stride=1, padding=1, keep_padded_cout=True,
                      out_dtype=jnp.bfloat16)
    b2 = conv_bn_relu(b2, p["b33_w3"], p["b33_s3"], p["b33_b3"],
                      stride=2, padding=0, keep_padded_cout=False,
                      out_dtype=jnp.float32)

    # branch_pool
    b3 = maxpool_3x3_s2(x)

    out = jnp.concatenate([b1, b2, b3], axis=-1)  # channel concat (NHWC)
    return jnp.transpose(out, (0, 3, 1, 2))       # back to NCHW


if __name__ == "__main__":
    key = jax.random.PRNGKey(0)
    k_x, k_p = jax.random.split(key)

    N, C, H, W = 2, 4, 16, 16
    x = jax.random.normal(k_x, (N, C, H, W), jnp.float32)
    params = init_block_b_params(k_p, C)

    out = jax.jit(block_b_forward)(x, params)
    out = jax.block_until_ready(out)

    expected_hw = (H - 3) // 2 + 1  # 7
    assert out.shape == (N, 384 + 96 + C, expected_hw, expected_hw), out.shape
    assert bool(jnp.all(jnp.isfinite(out)))
    print("KERNEL_OK")
</pallas_src>

<mosaic_0001>
module attributes {stable_mosaic.version = 11 : i64} {
  func.func @_maxpool9_kernel(%arg0: i32, %arg1: memref<4x1x8x8x4xf32, #tpu.memory_space<vmem>>, %arg2: memref<1x7x7x4xf32, #tpu.memory_space<vmem>>) attributes {dimension_semantics = [#tpu.dimension_semantics<parallel>], iteration_bounds = array<i64: 2>, scalar_prefetch = 0 : i64, scratch_operands = 0 : i64, tpu.core_type = #tpu.core_type<tc>, window_params = [{transform_indices = @transform_0, window_bounds = array<i64: 4, 1, 8, 8, 4>}, {transform_indices = @transform_1, window_bounds = array<i64: 1, 7, 7, 4>}]} {
    %c0 = arith.constant 0 : index
    %c0_0 = arith.constant 0 : index
    %c0_1 = arith.constant 0 : index
    %c0_2 = arith.constant 0 : index
    %c0_3 = arith.constant 0 : index
    %0 = vector.load %arg1[%c0, %c0_0, %c0_1, %c0_2, %c0_3] : memref<4x1x8x8x4xf32, #tpu.memory_space<vmem>>, vector<1x1x7x7x4xf32>
    %1 = vector.shape_cast %0 : vector<1x1x7x7x4xf32> to vector<7x7x4xf32>
    %c0_4 = arith.constant 0 : index
    %c0_5 = arith.constant 0 : index
    %c0_6 = arith.constant 0 : index
    %c1 = arith.constant 1 : index
    %c0_7 = arith.constant 0 : index
    %2 = vector.load %arg1[%c0_4, %c0_5, %c0_6, %c1, %c0_7] : memref<4x1x8x8x4xf32, #tpu.memory_space<vmem>>, vector<1x1x7x7x4xf32>
    %3 = vector.shape_cast %2 : vector<1x1x7x7x4xf32> to vector<7x7x4xf32>
    %4 = arith.maximumf %1, %3 : vector<7x7x4xf32>
    %c0_8 = arith.constant 0 : index
    %c0_9 = arith.constant 0 : index
    %c1_10 = arith.constant 1 : index
    %c0_11 = arith.constant 0 : index
    %c0_12 = arith.constant 0 : index
    %5 = vector.load %arg1[%c0_8, %c0_9, %c1_10, %c0_11, %c0_12] : memref<4x1x8x8x4xf32, #tpu.memory_space<vmem>>, vector<1x1x7x7x4xf32>
    %6 = vector.shape_cast %5 : vector<1x1x7x7x4xf32> to vector<7x7x4xf32>
    %7 = arith.maximumf %4, %6 : vector<7x7x4xf32>
    %c0_13 = arith.constant 0 : index
    %c0_14 = arith.constant 0 : index
    %c1_15 = arith.constant 1 : index
    %c1_16 = arith.constant 1 : index
    %c0_17 = arith.constant 0 : index
    %8 = vector.load %arg1[%c0_13, %c0_14, %c1_15, %c1_16, %c0_17] : memref<4x1x8x8x4xf32, #tpu.memory_space<vmem>>, vector<1x1x7x7x4xf32>
    %9 = vector.shape_cast %8 : vector<1x1x7x7x4xf32> to vector<7x7x4xf32>
    %10 = arith.maximumf %7, %9 : vector<7x7x4xf32>
    %c1_18 = arith.constant 1 : index
    %c0_19 = arith.constant 0 : index
    %c0_20 = arith.constant 0 : index
    %c0_21 = arith.constant 0 : index
    %c0_22 = arith.constant 0 : index
    %11 = vector.load %arg1[%c1_18, %c0_19, %c0_20, %c0_21, %c0_22] : memref<4x1x8x8x4xf32, #tpu.memory_space<vmem>>, vector<1x1x7x7x4xf32>
    %12 = vector.shape_cast %11 : vector<1x1x7x7x4xf32> to vector<7x7x4xf32>
    %13 = arith.maximumf %10, %12 : vector<7x7x4xf32>
    %c1_23 = arith.constant 1 : index
    %c0_24 = arith.constant 0 : index
    %c1_25 = arith.constant 1 : index
    %c0_26 = arith.constant 0 : index
    %c0_27 = arith.constant 0 : index
    %14 = vector.load %arg1[%c1_23, %c0_24, %c1_25, %c0_26, %c0_27] : memref<4x1x8x8x4xf32, #tpu.memory_space<vmem>>, vector<1x1x7x7x4xf32>
    %15 = vector.shape_cast %14 : vector<1x1x7x7x4xf32> to vector<7x7x4xf32>
    %16 = arith.maximumf %13, %15 : vector<7x7x4xf32>
    %c2 = arith.constant 2 : index
    %c0_28 = arith.constant 0 : index
    %c0_29 = arith.constant 0 : index
    %c0_30 = arith.constant 0 : index
    %c0_31 = arith.constant 0 : index
    %17 = vector.load %arg1[%c2, %c0_28, %c0_29, %c0_30, %c0_31] : memref<4x1x8x8x4xf32, #tpu.memory_space<vmem>>, vector<1x1x7x7x4xf32>
    %18 = vector.shape_cast %17 : vector<1x1x7x7x4xf32> to vector<7x7x4xf32>
    %19 = arith.maximumf %16, %18 : vector<7x7x4xf32>
    %c2_32 = arith.constant 2 : index
    %c0_33 = arith.constant 0 : index
    %c0_34 = arith.constant 0 : index
    %c1_35 = arith.constant 1 : index
    %c0_36 = arith.constant 0 : index
    %20 = vector.load %arg1[%c2_32, %c0_33, %c0_34, %c1_35, %c0_36] : memref<4x1x8x8x4xf32, #tpu.memory_space<vmem>>, vector<1x1x7x7x4xf32>
    %21 = vector.shape_cast %20 : vector<1x1x7x7x4xf32> to vector<7x7x4xf32>
    %22 = arith.maximumf %19, %21 : vector<7x7x4xf32>
    %c3 = arith.constant 3 : index
    %c0_37 = arith.constant 0 : index
    %c0_38 = arith.constant 0 : index
    %c0_39 = arith.constant 0 : index
    %c0_40 = arith.constant 0 : index
    %23 = vector.load %arg1[%c3, %c0_37, %c0_38, %c0_39, %c0_40] : memref<4x1x8x8x4xf32, #tpu.memory_space<vmem>>, vector<1x1x7x7x4xf32>
    %24 = vector.shape_cast %23 : vector<1x1x7x7x4xf32> to vector<7x7x4xf32>
    %25 = arith.maximumf %22, %24 : vector<7x7x4xf32>
    %c0_41 = arith.constant 0 : index
    %c0_42 = arith.constant 0 : index
    %c0_43 = arith.constant 0 : index
    %c0_44 = arith.constant 0 : index
    %26 = vector.load %arg2[%c0_41, %c0_42, %c0_43, %c0_44] : memref<1x7x7x4xf32, #tpu.memory_space<vmem>>, vector<1x7x7x4xf32>
    %27 = vector.shape_cast %26 : vector<1x7x7x4xf32> to vector<7x7x4xf32>
    %28 = vector.shape_cast %25 : vector<7x7x4xf32> to vector<1x7x7x4xf32>
    tpu.vector_store %arg2[%c0_41, %c0_42, %c0_43, %c0_44], %28 {strides = array<i32>} : memref<1x7x7x4xf32, #tpu.memory_space<vmem>>, vector<1x7x7x4xf32>,
    return
  }
  func.func @transform_0(%arg0: i32) -> (i32, i32, i32, i32, i32) {
    %c0_i32 = arith.constant 0 : i32
    %c0_i32_0 = arith.constant 0 : i32
    %c0_i32_1 = arith.constant 0 : i32
    %c0_i32_2 = arith.constant 0 : i32
    %c0_i32_3 = arith.constant 0 : i32
    return %c0_i32, %arg0, %c0_i32_0, %c0_i32_1, %c0_i32_2 : i32, i32, i32, i32, i32
  }
  func.func @transform_1(%arg0: i32) -> (i32, i32, i32, i32) {
    %c0_i32 = arith.constant 0 : i32
    %c0_i32_0 = arith.constant 0 : i32
    %c0_i32_1 = arith.constant 0 : i32
    %c0_i32_2 = arith.constant 0 : i32
    return %arg0, %c0_i32, %c0_i32_0, %c0_i32_1 : i32, i32, i32, i32
  }
}

module attributes {stable_mosaic.version = 11 : i64} {
  func.func @_matmul_bias_relu_kernel(%arg0: i32, %arg1: memref<256x128xbf16, #tpu.memory_space<vmem>>, %arg2: memref<128x128xbf16, #tpu.memory_space<vmem>>, %arg3: memref<1x128xf32, #tpu.memory_space<vmem>>, %arg4: memref<256x128xbf16, #tpu.memory_space<vmem>>) attributes {dimension_semantics = [#tpu.dimension_semantics<parallel>], iteration_bounds = array<i64: 2>, scalar_prefetch = 0 : i64, scratch_operands = 0 : i64, tpu.core_type = #tpu.core_type<tc>, window_params = [{transform_indices = @transform_0, window_bounds = array<i64: 256, 128>}, {pipeline_mode = #tpu.pipeline_mode<synchronous>, transform_indices = @transform_1, window_bounds = array<i64: 128, 128>}, {pipeline_mode = #tpu.pipeline_mode<synchronous>, transform_indices = @transform_2, window_bounds = array<i64: 1, 128>}, {transform_indices = @transform_3, window_bounds = array<i64: 256, 128>}]} {
    %c0 = arith.constant 0 : index
    %c0_0 = arith.constant 0 : index
    %0 = vector.load %arg1[%c0, %c0_0] : memref<256x128xbf16, #tpu.memory_space<vmem>>, vector<256x128xbf16>
    %c0_1 = arith.constant 0 : index
    %c0_2 = arith.constant 0 : index
    %1 = vector.load %arg2[%c0_1, %c0_2] : memref<128x128xbf16, #tpu.memory_space<vmem>>, vector<128x128xbf16>
    %cst = arith.constant dense<0.000000e+00> : vector<256x128xf32>
    %2 = tpu.matmul %0, %1, %cst {dimension_numbers = #tpu.dot_dimension_numbers<[1], [0], [0], [1], [0, 0, 1, 1], [], []>} : vector<256x128xbf16>, vector<128x128xbf16>, vector<256x128xf32> -> vector<256x128xf32>
    %c0_3 = arith.constant 0 : index
    %c0_4 = arith.constant 0 : index
    %3 = vector.load %arg3[%c0_3, %c0_4] : memref<1x128xf32, #tpu.memory_space<vmem>>, vector<1x128xf32>
    %4 = vector.broadcast %3 : vector<1x128xf32> to vector<256x128xf32>
    %5 = arith.addf %2, %4 : vector<256x128xf32>
    %cst_5 = arith.constant 0.000000e+00 : f32
    %6 = vector.broadcast %cst_5 : f32 to vector<256x128xf32>
    %7 = arith.maximumf %5, %6 : vector<256x128xf32>
    %8 = arith.truncf %7 : vector<256x128xf32> to vector<256x128xbf16>
    %c0_6 = arith.constant 0 : index
    %c0_7 = arith.constant 0 : index
    %9 = vector.load %arg4[%c0_6, %c0_7] : memref<256x128xbf16, #tpu.memory_space<vmem>>, vector<256x128xbf16>
    tpu.vector_store %arg4[%c0_6, %c0_7], %8 {strides = array<i32>} : memref<256x128xbf16, #tpu.memory_space<vmem>>, vector<256x128xbf16>,
    return
  }
  func.func @transform_0(%arg0: i32) -> (i32, i32) {
    %c0_i32 = arith.constant 0 : i32
    %c0_i32_0 = arith.constant 0 : i32
    return %arg0, %c0_i32 : i32, i32
  }
  func.func @transform_1(%arg0: i32) -> (i32, i32) {
    %c0_i32 = arith.constant 0 : i32
    %c0_i32_0 = arith.constant 0 : i32
    %c0_i32_1 = arith.constant 0 : i32
    return %c0_i32, %c0_i32_0 : i32, i32
  }
  func.func @transform_2(%arg0: i32) -> (i32, i32) {
    %c0_i32 = arith.constant 0 : i32
    %c0_i32_0 = arith.constant 0 : i32
    %c0_i32_1 = arith.constant 0 : i32
    return %c0_i32, %c0_i32_0 : i32, i32
  }
  func.func @transform_3(%arg0: i32) -> (i32, i32) {
    %c0_i32 = arith.constant 0 : i32
    %c0_i32_0 = arith.constant 0 : i32
    return %arg0, %c0_i32 : i32, i32
  }
}

module attributes {stable_mosaic.version = 11 : i64} {
  func.func @_matmul_bias_relu_kernel(%arg0: i32, %arg1: memref<256x640xbf16, #tpu.memory_space<vmem>>, %arg2: memref<640x128xbf16, #tpu.memory_space<vmem>>, %arg3: memref<1x128xf32, #tpu.memory_space<vmem>>, %arg4: memref<256x128xbf16, #tpu.memory_space<vmem>>) attributes {dimension_semantics = [#tpu.dimension_semantics<parallel>], iteration_bounds = array<i64: 2>, scalar_prefetch = 0 : i64, scratch_operands = 0 : i64, tpu.core_type = #tpu.core_type<tc>, window_params = [{transform_indices = @transform_0, window_bounds = array<i64: 256, 640>}, {pipeline_mode = #tpu.pipeline_mode<synchronous>, transform_indices = @transform_1, window_bounds = array<i64: 640, 128>}, {pipeline_mode = #tpu.pipeline_mode<synchronous>, transform_indices = @transform_2, window_bounds = array<i64: 1, 128>}, {transform_indices = @transform_3, window_bounds = array<i64: 256, 128>}]} {
    %c0 = arith.constant 0 : index
    %c0_0 = arith.constant 0 : index
    %0 = vector.load %arg1[%c0, %c0_0] : memref<256x640xbf16, #tpu.memory_space<vmem>>, vector<256x640xbf16>
    %c0_1 = arith.constant 0 : index
    %c0_2 = arith.constant 0 : index
    %1 = vector.load %arg2[%c0_1, %c0_2] : memref<640x128xbf16, #tpu.memory_space<vmem>>, vector<640x128xbf16>
    %cst = arith.constant dense<0.000000e+00> : vector<256x128xf32>
    %2 = tpu.matmul %0, %1, %cst {dimension_numbers = #tpu.dot_dimension_numbers<[1], [0], [0], [1], [0, 0, 1, 1], [], []>} : vector<256x640xbf16>, vector<640x128xbf16>, vector<256x128xf32> -> vector<256x128xf32>
    %c0_3 = arith.constant 0 : index
    %c0_4 = arith.constant 0 : index
    %3 = vector.load %arg3[%c0_3, %c0_4] : memref<1x128xf32, #tpu.memory_space<vmem>>, vector<1x128xf32>
    %4 = vector.broadcast %3 : vector<1x128xf32> to vector<256x128xf32>
    %5 = arith.addf %2, %4 : vector<256x128xf32>
    %cst_5 = arith.constant 0.000000e+00 : f32
    %6 = vector.broadcast %cst_5 : f32 to vector<256x128xf32>
    %7 = arith.maximumf %5, %6 : vector<256x128xf32>
    %8 = arith.truncf %7 : vector<256x128xf32> to vector<256x128xbf16>
    %c0_6 = arith.constant 0 : index
    %c0_7 = arith.constant 0 : index
    %9 = vector.load %arg4[%c0_6, %c0_7] : memref<256x128xbf16, #tpu.memory_space<vmem>>, vector<256x128xbf16>
    tpu.vector_store %arg4[%c0_6, %c0_7], %8 {strides = array<i32>} : memref<256x128xbf16, #tpu.memory_space<vmem>>, vector<256x128xbf16>,
    return
  }
  func.func @transform_0(%arg0: i32) -> (i32, i32) {
    %c0_i32 = arith.constant 0 : i32
    %c0_i32_0 = arith.constant 0 : i32
    return %arg0, %c0_i32 : i32, i32
  }
  func.func @transform_1(%arg0: i32) -> (i32, i32) {
    %c0_i32 = arith.constant 0 : i32
    %c0_i32_0 = arith.constant 0 : i32
    %c0_i32_1 = arith.constant 0 : i32
    return %c0_i32, %c0_i32_0 : i32, i32
  }
  func.func @transform_2(%arg0: i32) -> (i32, i32) {
    %c0_i32 = arith.constant 0 : i32
    %c0_i32_0 = arith.constant 0 : i32
    %c0_i32_1 = arith.constant 0 : i32
    return %c0_i32, %c0_i32_0 : i32, i32
  }
  func.func @transform_3(%arg0: i32) -> (i32, i32) {
    %c0_i32 = arith.constant 0 : i32
    %c0_i32_0 = arith.constant 0 : i32
    return %arg0, %c0_i32 : i32, i32
  }
}

module attributes {stable_mosaic.version = 11 : i64} {
  func.func @_matmul_bias_relu_kernel(%arg0: i32, %arg1: memref<56x896xbf16, #tpu.memory_space<vmem>>, %arg2: memref<896x128xbf16, #tpu.memory_space<vmem>>, %arg3: memref<1x128xf32, #tpu.memory_space<vmem>>, %arg4: memref<56x128xf32, #tpu.memory_space<vmem>>) attributes {dimension_semantics = [#tpu.dimension_semantics<parallel>], iteration_bounds = array<i64: 2>, scalar_prefetch = 0 : i64, scratch_operands = 0 : i64, tpu.core_type = #tpu.core_type<tc>, window_params = [{transform_indices = @transform_0, window_bounds = array<i64: 56, 896>}, {pipeline_mode = #tpu.pipeline_mode<synchronous>, transform_indices = @transform_1, window_bounds = array<i64: 896, 128>}, {pipeline_mode = #tpu.pipeline_mode<synchronous>, transform_indices = @transform_2, window_bounds = array<i64: 1, 128>}, {transform_indices = @transform_3, window_bounds = array<i64: 56, 128>}]} {
    %c0 = arith.constant 0 : index
    %c0_0 = arith.constant 0 : index
    %0 = vector.load %arg1[%c0, %c0_0] : memref<56x896xbf16, #tpu.memory_space<vmem>>, vector<56x896xbf16>
    %c0_1 = arith.constant 0 : index
    %c0_2 = arith.constant 0 : index
    %1 = vector.load %arg2[%c0_1, %c0_2] : memref<896x128xbf16, #tpu.memory_space<vmem>>, vector<896x128xbf16>
    %cst = arith.constant dense<0.000000e+00> : vector<56x128xf32>
    %2 = tpu.matmul %0, %1, %cst {dimension_numbers = #tpu.dot_dimension_numbers<[1], [0], [0], [1], [0, 0, 1, 1], [], []>} : vector<56x896xbf16>, vector<896x128xbf16>, vector<56x128xf32> -> vector<56x128xf32>
    %c0_3 = arith.constant 0 : index
    %c0_4 = arith.constant 0 : index
    %3 = vector.load %arg3[%c0_3, %c0_4] : memref<1x128xf32, #tpu.memory_space<vmem>>, vector<1x128xf32>
    %4 = vector.broadcast %3 : vector<1x128xf32> to vector<56x128xf32>
    %5 = arith.addf %2, %4 : vector<56x128xf32>
    %cst_5 = arith.constant 0.000000e+00 : f32
    %6 = vector.broadcast %cst_5 : f32 to vector<56x128xf32>
    %7 = arith.maximumf %5, %6 : vector<56x128xf32>
    %c0_6 = arith.constant 0 : index
    %c0_7 = arith.constant 0 : index
    %8 = vector.load %arg4[%c0_6, %c0_7] : memref<56x128xf32, #tpu.memory_space<vmem>>, vector<56x128xf32>
    tpu.vector_store %arg4[%c0_6, %c0_7], %7 {strides = array<i32>} : memref<56x128xf32, #tpu.memory_space<vmem>>, vector<56x128xf32>,
    return
  }
  func.func @transform_0(%arg0: i32) -> (i32, i32) {
    %c0_i32 = arith.constant 0 : i32
    %c0_i32_0 = arith.constant 0 : i32
    return %arg0, %c0_i32 : i32, i32
  }
  func.func @transform_1(%arg0: i32) -> (i32, i32) {
    %c0_i32 = arith.constant 0 : i32
    %c0_i32_0 = arith.constant 0 : i32
    %c0_i32_1 = arith.constant 0 : i32
    return %c0_i32, %c0_i32_0 : i32, i32
  }
  func.func @transform_2(%arg0: i32) -> (i32, i32) {
    %c0_i32 = arith.constant 0 : i32
    %c0_i32_0 = arith.constant 0 : i32
    %c0_i32_1 = arith.constant 0 : i32
    return %c0_i32, %c0_i32_0 : i32, i32
  }
  func.func @transform_3(%arg0: i32) -> (i32, i32) {
    %c0_i32 = arith.constant 0 : i32
    %c0_i32_0 = arith.constant 0 : i32
    return %arg0, %c0_i32 : i32, i32
  }
}

module attributes {stable_mosaic.version = 11 : i64} {
  func.func @_matmul_bias_relu_kernel(%arg0: i32, %arg1: memref<56x128xbf16, #tpu.memory_space<vmem>>, %arg2: memref<128x384xbf16, #tpu.memory_space<vmem>>, %arg3: memref<1x384xf32, #tpu.memory_space<vmem>>, %arg4: memref<56x384xf32, #tpu.memory_space<vmem>>) attributes {dimension_semantics = [#tpu.dimension_semantics<parallel>], iteration_bounds = array<i64: 2>, scalar_prefetch = 0 : i64, scratch_operands = 0 : i64, tpu.core_type = #tpu.core_type<tc>, window_params = [{transform_indices = @transform_0, window_bounds = array<i64: 56, 128>}, {pipeline_mode = #tpu.pipeline_mode<synchronous>, transform_indices = @transform_1, window_bounds = array<i64: 128, 384>}, {pipeline_mode = #tpu.pipeline_mode<synchronous>, transform_indices = @transform_2, window_bounds = array<i64: 1, 384>}, {transform_indices = @transform_3, window_bounds = array<i64: 56, 384>}]} {
    %c0 = arith.constant 0 : index
    %c0_0 = arith.constant 0 : index
    %0 = vector.load %arg1[%c0, %c0_0] : memref<56x128xbf16, #tpu.memory_space<vmem>>, vector<56x128xbf16>
    %c0_1 = arith.constant 0 : index
    %c0_2 = arith.constant 0 : index
    %1 = vector.load %arg2[%c0_1, %c0_2] : memref<128x384xbf16, #tpu.memory_space<vmem>>, vector<128x384xbf16>
    %cst = arith.constant dense<0.000000e+00> : vector<56x384xf32>
    %2 = tpu.matmul %0, %1, %cst {dimension_numbers = #tpu.dot_dimension_numbers<[1], [0], [0], [1], [0, 0, 1, 1], [], []>} : vector<56x128xbf16>, vector<128x384xbf16>, vector<56x384xf32> -> vector<56x384xf32>
    %c0_3 = arith.constant 0 : index
    %c0_4 = arith.constant 0 : index
    %3 = vector.load %arg3[%c0_3, %c0_4] : memref<1x384xf32, #tpu.memory_space<vmem>>, vector<1x384xf32>
    %4 = vector.broadcast %3 : vector<1x384xf32> to vector<56x384xf32>
    %5 = arith.addf %2, %4 : vector<56x384xf32>
    %cst_5 = arith.constant 0.000000e+00 : f32
    %6 = vector.broadcast %cst_5 : f32 to vector<56x384xf32>
    %7 = arith.maximumf %5, %6 : vector<56x384xf32>
    %c0_6 = arith.constant 0 : index
    %c0_7 = arith.constant 0 : index
    %8 = vector.load %arg4[%c0_6, %c0_7] : memref<56x384xf32, #tpu.memory_space<vmem>>, vector<56x384xf32>
    tpu.vector_store %arg4[%c0_6, %c0_7], %7 {strides = array<i32>} : memref<56x384xf32, #tpu.memory_space<vmem>>, vector<56x384xf32>,
    return
  }
  func.func @transform_0(%arg0: i32) -> (i32, i32) {
    %c0_i32 = arith.constant 0 : i32
    %c0_i32_0 = arith.constant 0 : i32
    return %arg0, %c0_i32 : i32, i32
  }
  func.func @transform_1(%arg0: i32) -> (i32, i32) {
    %c0_i32 = arith.constant 0 : i32
    %c0_i32_0 = arith.constant 0 : i32
    %c0_i32_1 = arith.constant 0 : i32
    return %c0_i32, %c0_i32_0 : i32, i32
  }
  func.func @transform_2(%arg0: i32) -> (i32, i32) {
    %c0_i32 = arith.constant 0 : i32
    %c0_i32_0 = arith.constant 0 : i32
    %c0_i32_1 = arith.constant 0 : i32
    return %c0_i32, %c0_i32_0 : i32, i32
  }
  func.func @transform_3(%arg0: i32) -> (i32, i32) {
    %c0_i32 = arith.constant 0 : i32
    %c0_i32_0 = arith.constant 0 : i32
    return %arg0, %c0_i32 : i32, i32
  }
}

</mosaic_0001>

<bundles_post_ra>
// kernel: block_b_forward.9
= control target key start
LH: loop header
LB: loop body
LE: loop exit
PB: predicated region body
PF: predicated region fallthrough
CT: control target
= control target key end

     0   :  { %s590_s6 = smov 0   ;;  %s592_s7 = smov 0   ;;  %s798_s0 = inlined_call_operand.vmem [shape: f32[4,2,8,8,4], index: 0, kind: input, shape index: {}]   ;;  %s799_s1 = inlined_call_operand.vmem [shape: f32[2,7,7,4], index: 1, kind: output, shape index: {}]  }
   0x1   :  { %s594_s8 = smov 0  }
   0x2 LB: > { %s469_s9 = sadd.s32 4294967295, %s578_s8   ;;  %s607_s10 = sadd.s32 1, %s578_s8   ;;  %s578_s8 = sphi %s594_s8, %s802_s8   ;;  %s574_s7 = sphi %s592_s7, %s801_s7   ;;  %s570_s6 = sphi %s590_s6, %s800_s6  }
   0x3   : > { %s15_s11 = ssub.s32 %s578_s8, %s607_s10  ;;  %s18_s12 = sadd.s32 1, %s574_s7 }
   0x4   : > { %p16_p0 = scmp.eq.s32.totalorder %s15_s11, 0  ;;  %p25_p1 = scmp.ne.s32.totalorder %s574_s7, %s570_s6 }
   0x5   : > { %p26_p2 = scmp.eq.s32.totalorder %s578_s8, 0  ;;  %p472_p4 = scmp.ge.s32.totalorder %s578_s8, 2 }
   0x6   : > { %s616_s13 = scalar_select %p16_p0, %s574_s7, %s18_s12  }
   0x7   : > { %p27_p3 = por %p26_p2, %p25_p1  ;;  %77 = sbr.rel (%p472_p4) target bundleno = 34 (0x22), region = 16 }
   0xe   : > { %80 = sbr.rel (!%p27_p3) target bundleno = 34 (0x22), region = 20  ;;  %s82_s14 = sand.u32 (%p27_p3), 1, %s574_s7  }
   0xf   : > { %s530_s15 = sshll.u32 (%p27_p3), %s578_s8, 6  ;;  %s473_s16 = sshll.u32 (%p27_p3), %s82_s14, 8 }
  0x10   : > { %s624_s19 = scalar_lea.vmem (%p27_p3), %s798_s0, %s530_s15  ;;  %s629_s20 = scalar_lea.vmem (%p27_p3), [#allocation2], %s473_s16 }
  0x11   : > { %v177_v0 = vld [vmem:[%s624_s19] sm:$0xff] (%p27_p3)  ;;  %v179_v1 = vld [vmem:[%s624_s19 + $0x8] sm:$0xff] (%p27_p3)  ;;  %v181_v2 = vld [vmem:[%s624_s19 + $0x10] sm:$0xff] (%p27_p3) }
  0x12   : > { %178 = vst [vmem:[%s629_s20] sm:$0xff] (%p27_p3), %v177_v0  ;;  %180 = vst [vmem:[%s629_s20 + $0x8] sm:$0xff] (%p27_p3), %v179_v1  ;;  %v183_v3 = vld [vmem:[%s624_s19 + $0x18] sm:$0xff] (%p27_p3)  ;;  %v185_v4 = vld [vmem:[%s624_s19 + $0x20] sm:$0xff] (%p27_p3) }
  0x13   : > { %182 = vst [vmem:[%s629_s20 + $0x10] sm:$0xff] (%p27_p3), %v181_v2  ;;  %v187_v5 = vld [vmem:[%s624_s19 + $0x28] sm:$0xff] (%p27_p3)  ;;  %184 = vst [vmem:[%s629_s20 + $0x18] sm:$0xff] (%p27_p3), %v183_v3  ;;  %v189_v6 = vld [vmem:[%s624_s19 + $0x30] sm:$0xff] (%p27_p3) }
  0x14   : > { %186 = vst [vmem:[%s629_s20 + $0x20] sm:$0xff] (%p27_p3), %v185_v4  ;;  %188 = vst [vmem:[%s629_s20 + $0x28] sm:$0xff] (%p27_p3), %v187_v5  ;;  %v191_v7 = vld [vmem:[%s624_s19 + $0x38] sm:$0xff] (%p27_p3)  ;;  %v193_v8 = vld [vmem:[%s624_s19 + $0x80] sm:$0xff] (%p27_p3) }
  0x15   : > { %190 = vst [vmem:[%s629_s20 + $0x30] sm:$0xff] %v189_v6  ;;  %192 = vst [vmem:[%s629_s20 + $0x38] sm:$0xff] %v191_v7  ;;  %v195_v9 = vld [vmem:[%s624_s19 + $0x88] sm:$0xff]  ;;  %v197_v10 = vld [vmem:[%s624_s19 + $0x90] sm:$0xff] }
  0x16   : > { %194 = vst [vmem:[%s629_s20 + $0x40] sm:$0xff] %v193_v8  ;;  %v199_v11 = vld [vmem:[%s624_s19 + $0x98] sm:$0xff]  ;;  %196 = vst [vmem:[%s629_s20 + $0x48] sm:$0xff] %v195_v9  ;;  %v201_v12 = vld [vmem:[%s624_s19 + $0xa0] sm:$0xff] }
  0x17   : > { %198 = vst [vmem:[%s629_s20 + $0x50] sm:$0xff] %v197_v10  ;;  %200 = vst [vmem:[%s629_s20 + $0x58] sm:$0xff] %v199_v11  ;;  %v203_v13 = vld [vmem:[%s624_s19 + $0xa8] sm:$0xff]  ;;  %v205_v14 = vld [vmem:[%s624_s19 + $0xb0] sm:$0xff] }
  0x18   : > { %202 = vst [vmem:[%s629_s20 + $0x60] sm:$0xff] %v201_v12  ;;  %204 = vst [vmem:[%s629_s20 + $0x68] sm:$0xff] %v203_v13  ;;  %v207_v15 = vld [vmem:[%s624_s19 + $0xb8] sm:$0xff]  ;;  %v209_v16 = vld [vmem:[%s624_s19 + $0x100] sm:$0xff] }
  0x19   : > { %206 = vst [vmem:[%s629_s20 + $0x70] sm:$0xff] %v205_v14  ;;  %v211_v17 = vld [vmem:[%s624_s19 + $0x108] sm:$0xff]  ;;  %208 = vst [vmem:[%s629_s20 + $0x78] sm:$0xff] %v207_v15  ;;  %v213_v18 = vld [vmem:[%s624_s19 + $0x110] sm:$0xff] }
  0x1a   : > { %210 = vst [vmem:[%s629_s20 + $0x80] sm:$0xff] %v209_v16  ;;  %212 = vst [vmem:[%s629_s20 + $0x88] sm:$0xff] %v211_v17  ;;  %v215_v19 = vld [vmem:[%s624_s19 + $0x118] sm:$0xff]  ;;  %v217_v20 = vld [vmem:[%s624_s19 + $0x120] sm:$0xff] }
  0x1b   : > { %214 = vst [vmem:[%s629_s20 + $0x90] sm:$0xff] %v213_v18  ;;  %216 = vst [vmem:[%s629_s20 + $0x98] sm:$0xff] %v215_v19  ;;  %v219_v21 = vld [vmem:[%s624_s19 + $0x128] sm:$0xff]  ;;  %v221_v22 = vld [vmem:[%s624_s19 + $0x130] sm:$0xff] }
  0x1c   : > { %218 = vst [vmem:[%s629_s20 + $0xa0] sm:$0xff] %v217_v20  ;;  %v223_v23 = vld [vmem:[%s624_s19 + $0x138] sm:$0xff]  ;;  %220 = vst [vmem:[%s629_s20 + $0xa8] sm:$0xff] %v219_v21  ;;  %v225_v24 = vld [vmem:[%s624_s19 + $0x180] sm:$0xff] }
  0x1d   : > { %222 = vst [vmem:[%s629_s20 + $0xb0] sm:$0xff] %v221_v22  ;;  %224 = vst [vmem:[%s629_s20 + $0xb8] sm:$0xff] %v223_v23  ;;  %v227_v25 = vld [vmem:[%s624_s19 + $0x188] sm:$0xff]  ;;  %v229_v26 = vld [vmem:[%s624_s19 + $0x190] sm:$0xff] }
  0x1e   : > { %226 = vst [vmem:[%s629_s20 + $0xc0] sm:$0xff] %v225_v24  ;;  %228 = vst [vmem:[%s629_s20 + $0xc8] sm:$0xff] %v227_v25  ;;  %v231_v27 = vld [vmem:[%s624_s19 + $0x198] sm:$0xff]  ;;  %v233_v28 = vld [vmem:[%s624_s19 + $0x1a0] sm:$0xff] }
  0x1f   : > { %230 = vst [vmem:[%s629_s20 + $0xd0] sm:$0xff] %v229_v26  ;;  %v235_v29 = vld [vmem:[%s624_s19 + $0x1a8] sm:$0xff]  ;;  %232 = vst [vmem:[%s629_s20 + $0xd8] sm:$0xff] %v231_v27  ;;  %v237_v30 = vld [vmem:[%s624_s19 + $0x1b0] sm:$0xff] }
  0x20   : > { %234 = vst [vmem:[%s629_s20 + $0xe0] sm:$0xff] %v233_v28  ;;  %236 = vst [vmem:[%s629_s20 + $0xe8] sm:$0xff] %v235_v29  ;;  %v239_v31 = vld [vmem:[%s624_s19 + $0x1b8] sm:$0xff] }
  0x21   : > { %238 = vst [vmem:[%s629_s20 + $0xf0] sm:$0xff] %v237_v30  ;;  %240 = vst [vmem:[%s629_s20 + $0xf8] sm:$0xff] %v239_v31 }
  0x22 PF: > { %p476_p5 = scmp.ge.s32.totalorder %s578_s8, 1  ;;  %p245_p6 = scmp.lt.s32.totalorder %s578_s8, 3 }
  0x24   : > { %p246_p7 = pnand %p476_p5, %p245_p6 }
  0x25   : > { %s252_s21 = sand.u32 (!%p246_p7), 1, %s570_s6   ;;  %p271_p8 = scmp.lt.s32.totalorder (!%p246_p7), %s469_s9, 1  ;;  %vm400_vm0 = vcmask (!%p246_p7), 30720  }
  0x26   : > { %249 = sbr.rel (%p246_p7) target bundleno = 74 (0x4a), region = 58  ;;  %s477_s22 = sshll.u32 (!%p246_p7), %s252_s21, 8 }
  0x27   : > { %s697_s23 = scalar_lea.vmem (!%p246_p7), [#allocation2], %s477_s22 }
  0x28   : > { %v276_v32 = vld [vmem:[%s697_s23] sm:$0x7f] (!%p246_p7)  ;;  %v479_v35 = vld [vmem:[%s697_s23 + $0x8] sm:$0x7f] (!%p246_p7)  ;;  %v480_v41 = vld [vmem:[%s697_s23 + $0x10] sm:$0x7f] (!%p246_p7) }
  0x29   : > { %v283_v33 = vld [vmem:[%s697_s23 + $0x1] sm:$0x7f] (!%p246_p7)  ;;  %v486_v36 = vld [vmem:[%s697_s23 + $0x9] sm:$0x7f] (!%p246_p7)  ;;  %v487_v45 = vld [vmem:[%s697_s23 + $0x11] sm:$0x7f] (!%p246_p7) }
  0x2a   : > { %v290_v34 = vmax.f32 (!%p246_p7), %v276_v32, %v283_v33  ;;  %v277_v38 = vld [vmem:[%s697_s23 + $0x8] sm:$0x7f] (!%p246_p7)  ;;  %v493_v39 = vld [vmem:[%s697_s23 + $0x40] sm:$0x7f] (!%p246_p7)  ;;  %v278_v46 = vld [vmem:[%s697_s23 + $0x10] sm:$0x7f] (!%p246_p7) }
  0x2b   : > { %v284_v40 = vld [vmem:[%s697_s23 + $0x9] sm:$0x7f] (!%p246_p7)  ;;  %v285_v49 = vld [vmem:[%s697_s23 + $0x11] sm:$0x7f] (!%p246_p7)  ;;  %v481_v50 = vld [vmem:[%s697_s23 + $0x18] sm:$0x7f] (!%p246_p7) }
  0x2c   : > { %v305_v37 = vmax.f32 (!%p246_p7), %v290_v34, %v479_v35  ;;  %v291_v43 = vmax.f32 (!%p246_p7), %v277_v38, %v284_v40  ;;  %v500_v44 = vld [vmem:[%s697_s23 + $0x48] sm:$0x7f] (!%p246_p7)  ;;  %v507_v51 = vld [vmem:[%s697_s23 + $0x80] sm:$0x7f] (!%p246_p7)  ;;  %v292_v53 = vmax.f32 (!%p246_p7), %v278_v46, %v285_v49  ;;  %v488_v57 = vld [vmem:[%s697_s23 + $0x19] sm:$0x7f] (!%p246_p7) }
  0x2d   : > { %s804_s9 = smov (!%p271_p8, %s469_s9), 1  ;;  %v494_v52 = vld [vmem:[%s697_s23 + $0x48] sm:$0x7f]  ;;  %v514_v55 = vld [vmem:[%s697_s23 + $0x81] sm:$0x7f] }
  0x2e   : > { %v319_v42 = vmax.f32 %v305_v37, %v486_v36  ;;  %v306_v48 = vmax.f32 %v291_v43, %v480_v41  ;;  %s531_s24 = smul.u32 56, %s804_s9  ;;  %v279_v58 = vld [vmem:[%s697_s23 + $0x18] sm:$0x7f]  ;;  %v501_v59 = vld [vmem:[%s697_s23 + $0x50] sm:$0x7f]  ;;  %v307_v60 = vmax.f32 %v292_v53, %v481_v50 }
  0x2f   : > { %v286_v61 = vld [vmem:[%s697_s23 + $0x19] sm:$0x7f]  ;;  %v482_v62 = vld [vmem:[%s697_s23 + $0x20] sm:$0x7f]  ;;  %v495_v2 = vld [vmem:[%s697_s23 + $0x50] sm:$0x7f] }
  0x30   : > { %v334_v47 = vmax.f32 %v319_v42, %v493_v39  ;;  %v320_v56 = vmax.f32 %v306_v48, %v487_v45  ;;  %v521_v0 = vld [vmem:[%s697_s23 + $0xc0] sm:$0x7f]  ;;  %v293_v3 = vmax.f32 %v279_v58, %v286_v61  ;;  %v508_v4 = vld [vmem:[%s697_s23 + $0x88] sm:$0x7f]  ;;  %v321_v5 = vmax.f32 %v307_v60, %v488_v57  ;;  %v502_v10 = vld [vmem:[%s697_s23 + $0x58] sm:$0x7f]  ;;  %s738_s27 = scalar_lea.vmem %s799_s1, %s531_s24 }
  0x31   : > { %v489_v6 = vld [vmem:[%s697_s23 + $0x21] sm:$0x7f]  ;;  %v483_v13 = vld [vmem:[%s697_s23 + $0x28] sm:$0x7f]  ;;  %v496_v17 = vld [vmem:[%s697_s23 + $0x58] sm:$0x7f] }
  0x32   : > { %v349_v54 = vmax.f32 %v334_v47, %v500_v44  ;;  %v335_v1 = vmax.f32 %v320_v56, %v494_v52  ;;  %v280_v7 = vld [vmem:[%s697_s23 + $0x20] sm:$0x7f]  ;;  %v308_v11 = vmax.f32 %v293_v3, %v482_v62  ;;  %v515_v14 = vld [vmem:[%s697_s23 + $0x89] sm:$0x7f]  ;;  %v336_v16 = vmax.f32 %v321_v5, %v495_v2  ;;  %v509_v21 = vld [vmem:[%s697_s23 + $0x90] sm:$0x7f] }
  0x33   : > { %v287_v12 = vld [vmem:[%s697_s23 + $0x21] sm:$0x7f]  ;;  %v522_v15 = vld [vmem:[%s697_s23 + $0xc8] sm:$0x7f]  ;;  %v484_v29 = vld [vmem:[%s697_s23 + $0x30] sm:$0x7f] }
  0x34   : > { %v364_v63 = vmax.f32 %v349_v54, %v507_v51  ;;  %v350_v9 = vmax.f32 %v335_v1, %v501_v59  ;;  %v294_v18 = vmax.f32 %v280_v7, %v287_v12  ;;  %v322_v22 = vmax.f32 %v308_v11, %v489_v6  ;;  %v490_v23 = vld [vmem:[%s697_s23 + $0x29] sm:$0x7f]  ;;  %v503_v26 = vld [vmem:[%s697_s23 + $0x60] sm:$0x7f]  ;;  %v516_v31 = vld [vmem:[%s697_s23 + $0x91] sm:$0x7f] }
  0x35   : > { %v281_v24 = vld [vmem:[%s697_s23 + $0x28] sm:$0x7f]  ;;  %v351_v25 = vmax.f32 %v336_v16, %v502_v10  ;;  %v523_v32 = vld [vmem:[%s697_s23 + $0xd0] sm:$0x7f]  ;;  %v497_v34 = vld [vmem:[%s697_s23 + $0x60] sm:$0x7f] }
  0x36   : > { %v378_v8 = vmax.f32 %v364_v63, %v514_v55  ;;  %v365_v20 = vmax.f32 %v350_v9, %v508_v4  ;;  %v309_v27 = vmax.f32 %v294_v18, %v483_v13  ;;  %v288_v28 = vld [vmem:[%s697_s23 + $0x29] sm:$0x7f]  ;;  %v337_v33 = vmax.f32 %v322_v22, %v496_v17  ;;  %v510_v37 = vld [vmem:[%s697_s23 + $0x98] sm:$0x7f]  ;;  %v491_v39 = vld [vmem:[%s697_s23 + $0x31] sm:$0x7f] }
  0x37   : > { %v295_v35 = vmax.f32 %v281_v24, %v288_v28  ;;  %v366_v36 = vmax.f32 %v351_v25, %v509_v21  ;;  %v282_v40 = vld [vmem:[%s697_s23 + $0x30] sm:$0x7f]  ;;  %v504_v43 = vld [vmem:[%s697_s23 + $0x68] sm:$0x7f]  ;;  %v485_v46 = vld [vmem:[%s697_s23 + $0x38] sm:$0x7f] }
  0x38   : > { %v393_v19 = vmax.f32 %v378_v8, %v521_v0  ;;  %v379_v30 = vmax.f32 %v365_v20, %v515_v14  ;;  %v323_v38 = vmax.f32 %v309_v27, %v490_v23  ;;  %v352_v42 = vmax.f32 %v337_v33, %v503_v26  ;;  %v289_v45 = vld [vmem:[%s697_s23 + $0x31] sm:$0x7f]  ;;  %v517_v48 = vld [vmem:[%s697_s23 + $0x99] sm:$0x7f]  ;;  %v498_v50 = vld [vmem:[%s697_s23 + $0x68] sm:$0x7f] }
  0x39   : > { %v310_v44 = vmax.f32 %v295_v35, %v484_v29  ;;  %v380_v47 = vmax.f32 %v366_v36, %v516_v31  ;;  %v296_v51 = vmax.f32 %v282_v40, %v289_v45  ;;  %v511_v53 = vld [vmem:[%s697_s23 + $0xa0] sm:$0x7f]  ;;  %v492_v55 = vld [vmem:[%s697_s23 + $0x39] sm:$0x7f]  ;;  %v505_v59 = vld [vmem:[%s697_s23 + $0x70] sm:$0x7f] }
  0x3a   : > { %401 = vst.msk [vmem:[%s738_s27] sm:$0x7f] %vm400_vm0, %v393_v19  ;;  %v394_v41 = vmax.f32 %v379_v30, %v522_v15  ;;  %v338_v49 = vmax.f32 %v323_v38, %v497_v34  ;;  %v367_v52 = vmax.f32 %v352_v42, %v510_v37  ;;  %v524_v57 = vld [vmem:[%s697_s23 + $0xd8] sm:$0x7f]  ;;  %v518_v62 = vld [vmem:[%s697_s23 + $0xa1] sm:$0x7f] }
  0x3b   : > { %v324_v54 = vmax.f32 %v310_v44, %v491_v39  ;;  %v395_v56 = vmax.f32 %v380_v47, %v523_v32  ;;  %v311_v60 = vmax.f32 %v296_v51, %v485_v46  ;;  %v499_v0 = vld [vmem:[%s697_s23 + $0x70] sm:$0x7f]  ;;  %v512_v2 = vld [vmem:[%s697_s23 + $0xa8] sm:$0x7f]  ;;  %v525_v5 = vld [vmem:[%s697_s23 + $0xe0] sm:$0x7f] }
  0x3c   : > { %402 = vst.msk [vmem:[%s738_s27 + $0x8] sm:$0x7f] %vm400_vm0, %v394_v41  ;;  %v353_v58 = vmax.f32 %v338_v49, %v504_v43  ;;  %v381_v61 = vmax.f32 %v367_v52, %v517_v48  ;;  %v506_v7 = vld [vmem:[%s697_s23 + $0x78] sm:$0x7f]  ;;  %v519_v9 = vld [vmem:[%s697_s23 + $0xa9] sm:$0x7f] }
  0x3d   : > { %v339_v63 = vmax.f32 %v324_v54, %v498_v50  ;;  %403 = vst.msk [vmem:[%s738_s27 + $0x10] sm:$0x7f] %vm400_vm0, %v395_v56  ;;  %v325_v3 = vmax.f32 %v311_v60, %v492_v55  ;;  %v513_v12 = vld [vmem:[%s697_s23 + $0xb0] sm:$0x7f]  ;;  %v526_v14 = vld [vmem:[%s697_s23 + $0xe8] sm:$0x7f] }
  0x3e   : > { %v368_v1 = vmax.f32 %v353_v58, %v511_v53  ;;  %v396_v4 = vmax.f32 %v381_v61, %v524_v57  ;;  %v520_v17 = vld [vmem:[%s697_s23 + $0xb1] sm:$0x7f] }
  0x3f   : > { %v354_v6 = vmax.f32 %v339_v63, %v505_v59  ;;  %v340_v10 = vmax.f32 %v325_v3, %v499_v0  ;;  %v527_v20 = vld [vmem:[%s697_s23 + $0xf0] sm:$0x7f] }
  0x40   : > { %v382_v8 = vmax.f32 %v368_v1, %v518_v62  ;;  %404 = vst.msk [vmem:[%s738_s27 + $0x18] sm:$0x7f] %vm400_vm0, %v396_v4 }
  0x41   : > { %v369_v11 = vmax.f32 %v354_v6, %v512_v2  ;;  %v355_v15 = vmax.f32 %v340_v10, %v506_v7 }
  0x42   : > { %v397_v13 = vmax.f32 %v382_v8, %v525_v5 }
  0x43   : > { %v383_v16 = vmax.f32 %v369_v11, %v519_v9  ;;  %v370_v18 = vmax.f32 %v355_v15, %v513_v12 }
  0x44   : > { %405 = vst.msk [vmem:[%s738_s27 + $0x20] sm:$0x7f] %vm400_vm0, %v397_v13 }
  0x45   : > { %v398_v19 = vmax.f32 %v383_v16, %v526_v14  ;;  %v384_v21 = vmax.f32 %v370_v18, %v520_v17 }
  0x47   : > { %406 = vst.msk [vmem:[%s738_s27 + $0x28] sm:$0x7f] %vm400_vm0, %v398_v19  ;;  %v399_v22 = vmax.f32 %v384_v21, %v527_v20 }
  0x49   : > { %407 = vst.msk [vmem:[%s738_s27 + $0x30] sm:$0x7f] %vm400_vm0, %v399_v22 }
  0x4a PF: > { %p8_p9 = scmp.ge.s32.totalorder %s607_s10, 4   ;;  %s800_s6 = smov %s574_s7 }
  0x4b   : > { %s801_s7 = smov %s616_s13  ;;  %s802_s8 = smov %s607_s10 }
  0x4c   :  { %10 = sbr.rel (!%p8_p9) target bundleno = 2 (0x2), region = 102 }

// kernel: block_b_forward.6
= control target key start
LH: loop header
LB: loop body
LE: loop exit
PB: predicated region body
PF: predicated region fallthrough
CT: control target
= control target key end

     0   :  { %s1126_s12 = smov 0   ;;  %s1247_s0 = inlined_call_operand.vmem [shape: bf16[512,128], index: 0, kind: input, shape index: {}]   ;;  %s1248_s1 = inlined_call_operand.vmem [shape: bf16[128,128], index: 1, kind: input, shape index: {}]   ;;  %s1249_s2 = inlined_call_operand.vmem [shape: f32[1,128], index: 2, kind: input, shape index: {}]   ;;  %s1250_s3 = inlined_call_operand.vmem [shape: bf16[512,128], index: 3, kind: output, shape index: {}]  }
   0x1 LB: > { %s783_s13 = sadd.s32 4294967295, %s1104_s12   ;;  %p787_p0 = scmp.ge.s32.totalorder %s1104_s12, 1  ;;  %s1104_s12 = sphi %s1126_s12, %s13_s12  }
   0x2   : > { %p138_p1 = scmp.lt.s32.totalorder %s1104_s12, 3 }
   0x4   : > { %p139_p2 = pnand %p787_p0, %p138_p1 }
   0x5   : > { %v1074_v0 = vld [vmem:[%s1248_s1] sm:$0xff] (!%p139_p2)   ;;  %s788_s16 = sshll.u32 (!%p139_p2), %s783_s13, 5  ;;  %v1075_v1 = vld [vmem:[%s1248_s1 + $0x8] sm:$0xff] (!%p139_p2)   ;;  %v1076_v2 = vld [vmem:[%s1248_s1 + $0x10] sm:$0xff] (!%p139_p2)  }
   0x6   : > { %142 = sbr.rel (%p139_p2) target bundleno = 284 (0x11c), region = 32  ;;  %p163_p3 = scmp.lt.s32.totalorder (!%p139_p2), %s788_s16, 63  ;;  %1002 = vmatprep.subr.bf16.mxu0 (!%p139_p2), %v1074_v0  ;;  %1050 = vmatprep.subr.bf16.mxu1 (!%p139_p2), %v1074_v0  ;;  %v1077_v3 = vld [vmem:[%s1248_s1 + $0x18] sm:$0xff] (!%p139_p2)   ;;  %v1078_v6 = vld [vmem:[%s1248_s1 + $0x20] sm:$0xff] (!%p139_p2)   ;;  %v1079_v7 = vld [vmem:[%s1248_s1 + $0x28] sm:$0xff] (!%p139_p2)  }
   0x7   : > { %1003 = vmatpush3.bf16.msra.mxu0 (!%p139_p2), %v1074_v0  ;;  %1058 = vmatpush3.bf16.msra.mxu1 (!%p139_p2), %v1074_v0  ;;  %v1080_v8 = vld [vmem:[%s1248_s1 + $0x30] sm:$0xff] (!%p139_p2)   ;;  %v1081_v9 = vld [vmem:[%s1248_s1 + $0x38] sm:$0xff] (!%p139_p2)   ;;  %v1187_v24 = vld [vmem:[%s1249_s2] ss:$0 sm:$0xff] (!%p139_p2) }
   0x8   : > { %1004 = vmatprep.subr.bf16.mxu0 (!%p139_p2), %v1075_v1  ;;  %1051 = vmatprep.subr.bf16.mxu1 (!%p139_p2), %v1075_v1 }
   0xb   : > { %1005 = vmatpush3.bf16.msra.mxu0 (!%p139_p2), %v1075_v1  ;;  %1059 = vmatpush3.bf16.msra.mxu1 (!%p139_p2), %v1075_v1 }
   0xc   : > { %1006 = vmatprep.subr.bf16.mxu0 (!%p139_p2), %v1076_v2  ;;  %1052 = vmatprep.subr.bf16.mxu1 (!%p139_p2), %v1076_v2 }
   0xd   : > { %s1252_s16 = smov (!%p163_p3, %s788_s16), 63 }
   0xe   : > { %s789_s21 = sshll.u32 %s1252_s16, 2 }
   0xf   : > { %s1151_s24 = scalar_lea.vmem %s1247_s0, %s789_s21  ;;  %1007 = vmatpush3.bf16.msra.mxu0 %v1076_v2  ;;  %1060 = vmatpush3.bf16.msra.mxu1 %v1076_v2  ;;  %s1202_s13 = scalar_lea.vmem %s1250_s3, %s789_s21 }
  0x10   : > { %v1082_v4 = vld [vmem:[%s1151_s24] sm:$0xff]   ;;  %1008 = vmatprep.subr.bf16.mxu0 %v1077_v3  ;;  %1053 = vmatprep.subr.bf16.mxu1 %v1077_v3  ;;  %v1084_v10 = vld [vmem:[%s1151_s24 + $0x8] sm:$0xff]   ;;  %v1086_v12 = vld [vmem:[%s1151_s24 + $0x10] sm:$0xff]  }
  0x11   : > { %v1083_v5 = vld [vmem:[%s1151_s24 + $0x40] sm:$0xff]   ;;  %1018 = vmatprep.mubr.bf16.mxu0 %v1082_v4  ;;  %v1085_v11 = vld [vmem:[%s1151_s24 + $0x48] sm:$0xff]   ;;  %v1087_v13 = vld [vmem:[%s1151_s24 + $0x50] sm:$0xff]  }
  0x12   : > { %1034 = vmatprep.mubr.bf16.mxu1 %v1083_v5  ;;  %v1088_v14 = vld [vmem:[%s1151_s24 + $0x18] sm:$0xff]   ;;  %v1090_v16 = vld [vmem:[%s1151_s24 + $0x20] sm:$0xff]   ;;  %v1092_v18 = vld [vmem:[%s1151_s24 + $0x28] sm:$0xff]  }
  0x13   : > { %1009 = vmatpush3.bf16.msra.mxu0 %v1077_v3  ;;  %1061 = vmatpush3.bf16.msra.mxu1 %v1077_v3  ;;  %v1089_v15 = vld [vmem:[%s1151_s24 + $0x58] sm:$0xff]   ;;  %v1091_v17 = vld [vmem:[%s1151_s24 + $0x60] sm:$0xff]   ;;  %v1093_v19 = vld [vmem:[%s1151_s24 + $0x68] sm:$0xff]  }
  0x14   : > { %1010 = vmatprep.subr.bf16.mxu0 %v1078_v6  ;;  %1054 = vmatprep.subr.bf16.mxu1 %v1078_v6  ;;  %v1094_v20 = vld [vmem:[%s1151_s24 + $0x30] sm:$0xff]   ;;  %v1096_v22 = vld [vmem:[%s1151_s24 + $0x38] sm:$0xff]  }
  0x15   : > { %v1095_v21 = vld [vmem:[%s1151_s24 + $0x70] sm:$0xff]   ;;  %v1097_v23 = vld [vmem:[%s1151_s24 + $0x78] sm:$0xff]  }
  0x17   : > { %1011 = vmatpush3.bf16.msra.mxu0 %v1078_v6  ;;  %1062 = vmatpush3.bf16.msra.mxu1 %v1078_v6 }
  0x18   : > { %1012 = vmatprep.subr.bf16.mxu0 %v1079_v7  ;;  %1055 = vmatprep.subr.bf16.mxu1 %v1079_v7 }
  0x1b   : > { %1013 = vmatpush3.bf16.msra.mxu0 %v1079_v7  ;;  %1063 = vmatpush3.bf16.msra.mxu1 %v1079_v7 }
  0x1c   : > { %1014 = vmatprep.subr.bf16.mxu0 %v1080_v8  ;;  %1056 = vmatprep.subr.bf16.mxu1 %v1080_v8 }
  0x1f   : > { %1015 = vmatpush3.bf16.msra.mxu0 %v1080_v8  ;;  %1064 = vmatpush3.bf16.msra.mxu1 %v1080_v8 }
  0x20   : > { %1016 = vmatprep.subr.bf16.mxu0 %v1081_v9  ;;  %1057 = vmatprep.subr.bf16.mxu1 %v1081_v9 }
  0x23   : > { %1017 = vmatpush3.bf16.msra.mxu0 %v1081_v9  ;;  %1065 = vmatpush3.bf16.msra.mxu1 %v1081_v9 }
  0x26   : > { %1019 = vmatmul.mubr.bf16.vlgmr.msra.gmra.mrb[0].mxu0 %v1084_v10  ;;  %1035 = vmatmul.mubr.bf16.vlgmr.msra.gmra.mrb[0].mxu1 %v1085_v11 }
  0x27   : > { %1022 = vmatprep.mubr.bf16.mxu0 %v1086_v12  ;;  %1038 = vmatprep.mubr.bf16.mxu1 %v1087_v13 }
  0x2e   : > { %1023 = vmatmul.mubr.bf16.gmra.mrb[4].mxu0 %v1088_v14  ;;  %1039 = vmatmul.mubr.bf16.gmra.mrb[4].mxu1 %v1089_v15 }
  0x2f   : > { %1026 = vmatprep.mubr.bf16.mxu0 %v1090_v16  ;;  %1042 = vmatprep.mubr.bf16.mxu1 %v1091_v17 }
  0x36   : > { %1027 = vmatmul.mubr.bf16.gmra.mrb[8].mxu0 %v1092_v18  ;;  %1043 = vmatmul.mubr.bf16.gmra.mrb[8].mxu1 %v1093_v19 }
  0x37   : > { %1030 = vmatprep.mubr.bf16.mxu0 %v1094_v20  ;;  %1046 = vmatprep.mubr.bf16.mxu1 %v1095_v21 }
  0x3e   : > { %1031 = vmatmul.mubr.bf16.gmra.mrb[12].mxu0 %v1096_v22  ;;  %1047 = vmatmul.mubr.bf16.gmra.mrb[12].mxu1 %v1097_v23 }
  0xf9   : > { %v1020_v25 = vpop.f32.mrb[0].mxu0  ;;  %v1036_v26 = vpop.f32.mrb[0].mxu1 }
  0xfa   : > { %v417_v27 = vadd.f32 %v1020_v25, %v1187_v24  ;;  %v481_v28 = vadd.f32 %v1036_v26, %v1187_v24  ;;  %v408_v29 = vpop.f32.mrb[1].mxu0  ;;  %v472_v30 = vpop.f32.mrb[1].mxu1 }
  0xfb   : > { %v409_v31 = vadd.f32 %v1187_v24, %v408_v29  ;;  %v473_v32 = vadd.f32 %v1187_v24, %v472_v30  ;;  %v1021_v33 = vpop.f32.mrb[2].mxu0  ;;  %v1037_v34 = vpop.f32.mrb[2].mxu1 }
  0xfc   : > { %v420_v35 = vadd.f32 %v1021_v33, %v1187_v24  ;;  %v484_v36 = vadd.f32 %v1037_v34, %v1187_v24  ;;  %v411_v37 = vpop.f32.mrb[3].mxu0  ;;  %v475_v38 = vpop.f32.mrb[3].mxu1  ;;  %v537_v41 = vmax.f32 %v417_v27, 0.0  ;;  %v553_v42 = vmax.f32 %v481_v28, 0.0 }
  0xfd   : > { %v412_v39 = vadd.f32 %v1187_v24, %v411_v37  ;;  %v476_v40 = vadd.f32 %v1187_v24, %v475_v38  ;;  %v535_v45 = vmax.f32 %v409_v31, 0.0  ;;  %v551_v46 = vmax.f32 %v473_v32, 0.0 }
  0xfe   : > { %v538_v43 = vmax.f32 %v420_v35, 0.0  ;;  %v554_v44 = vmax.f32 %v484_v36, 0.0 }
  0xff   : > { %v536_v47 = vmax.f32 %v412_v39, 0.0  ;;  %v552_v48 = vmax.f32 %v476_v40, 0.0 }
 0x100   : > { %v891_v49 = vpack.c.bf16 %v538_v43, %v537_v41  ;;  %v931_v50 = vpack.c.bf16 %v554_v44, %v553_v42 }
 0x101   : > { %v886_v51 = vpack.c.bf16 %v536_v47, %v535_v45  ;;  %v926_v52 = vpack.c.bf16 %v552_v48, %v551_v46  ;;  %v1024_v53 = vpop.f32.mrb[4].mxu0  ;;  %v1040_v54 = vpop.f32.mrb[4].mxu1 }
 0x102   : > { %963 = vst [vmem:[%s1202_s13 + $0x8] sm:$0xff] %v891_v49   ;;  %971 = vst [vmem:[%s1202_s13 + $0x48] sm:$0xff] %v931_v50   ;;  %v433_v55 = vadd.f32 %v1024_v53, %v1187_v24  ;;  %v497_v56 = vadd.f32 %v1040_v54, %v1187_v24  ;;  %v424_v57 = vpop.f32.mrb[5].mxu0  ;;  %v488_v58 = vpop.f32.mrb[5].mxu1 }
 0x103   : > { %887 = vst [vmem:[%s1202_s13] sm:$0xff] %v886_v51   ;;  %970 = vst [vmem:[%s1202_s13 + $0x40] sm:$0xff] %v926_v52   ;;  %v425_v59 = vadd.f32 %v1187_v24, %v424_v57  ;;  %v489_v60 = vadd.f32 %v1187_v24, %v488_v58  ;;  %v1025_v61 = vpop.f32.mrb[6].mxu0  ;;  %v1041_v62 = vpop.f32.mrb[6].mxu1 }
 0x104   : > { %v436_v63 = vadd.f32 %v1025_v61, %v1187_v24  ;;  %v500_v0 = vadd.f32 %v1041_v62, %v1187_v24  ;;  %v427_v1 = vpop.f32.mrb[7].mxu0  ;;  %v491_v2 = vpop.f32.mrb[7].mxu1  ;;  %v541_v5 = vmax.f32 %v433_v55, 0.0  ;;  %v557_v6 = vmax.f32 %v497_v56, 0.0 }
 0x105   : > { %v428_v3 = vadd.f32 %v1187_v24, %v427_v1  ;;  %v492_v4 = vadd.f32 %v1187_v24, %v491_v2  ;;  %v539_v9 = vmax.f32 %v425_v59, 0.0  ;;  %v555_v10 = vmax.f32 %v489_v60, 0.0 }
 0x106   : > { %v542_v7 = vmax.f32 %v436_v63, 0.0  ;;  %v558_v8 = vmax.f32 %v500_v0, 0.0 }
 0x107   : > { %v540_v11 = vmax.f32 %v428_v3, 0.0  ;;  %v556_v12 = vmax.f32 %v492_v4, 0.0 }
 0x108   : > { %v901_v13 = vpack.c.bf16 %v542_v7, %v541_v5  ;;  %v941_v14 = vpack.c.bf16 %v558_v8, %v557_v6 }
 0x109   : > { %v896_v15 = vpack.c.bf16 %v540_v11, %v539_v9  ;;  %v936_v16 = vpack.c.bf16 %v556_v12, %v555_v10  ;;  %v1028_v17 = vpop.f32.mrb[8].mxu0  ;;  %v1044_v18 = vpop.f32.mrb[8].mxu1 }
 0x10a   : > { %965 = vst [vmem:[%s1202_s13 + $0x18] sm:$0xff] %v901_v13   ;;  %973 = vst [vmem:[%s1202_s13 + $0x58] sm:$0xff] %v941_v14   ;;  %v449_v19 = vadd.f32 %v1028_v17, %v1187_v24  ;;  %v513_v20 = vadd.f32 %v1044_v18, %v1187_v24  ;;  %v440_v21 = vpop.f32.mrb[9].mxu0  ;;  %v504_v22 = vpop.f32.mrb[9].mxu1 }
 0x10b   : > { %964 = vst [vmem:[%s1202_s13 + $0x10] sm:$0xff] %v896_v15   ;;  %972 = vst [vmem:[%s1202_s13 + $0x50] sm:$0xff] %v936_v16   ;;  %v441_v23 = vadd.f32 %v1187_v24, %v440_v21  ;;  %v505_v25 = vadd.f32 %v1187_v24, %v504_v22  ;;  %v1029_v26 = vpop.f32.mrb[10].mxu0  ;;  %v1045_v27 = vpop.f32.mrb[10].mxu1 }
 0x10c   : > { %v452_v28 = vadd.f32 %v1029_v26, %v1187_v24  ;;  %v516_v29 = vadd.f32 %v1045_v27, %v1187_v24  ;;  %v443_v30 = vpop.f32.mrb[11].mxu0  ;;  %v507_v31 = vpop.f32.mrb[11].mxu1  ;;  %v545_v34 = vmax.f32 %v449_v19, 0.0  ;;  %v561_v35 = vmax.f32 %v513_v20, 0.0 }
 0x10d   : > { %v444_v32 = vadd.f32 %v1187_v24, %v443_v30  ;;  %v508_v33 = vadd.f32 %v1187_v24, %v507_v31  ;;  %v543_v38 = vmax.f32 %v441_v23, 0.0  ;;  %v559_v39 = vmax.f32 %v505_v25, 0.0 }
 0x10e   : > { %v546_v36 = vmax.f32 %v452_v28, 0.0  ;;  %v562_v37 = vmax.f32 %v516_v29, 0.0 }
 0x10f   : > { %v544_v40 = vmax.f32 %v444_v32, 0.0  ;;  %v560_v41 = vmax.f32 %v508_v33, 0.0 }
 0x110   : > { %v911_v42 = vpack.c.bf16 %v546_v36, %v545_v34  ;;  %v951_v43 = vpack.c.bf16 %v562_v37, %v561_v35 }
 0x111   : > { %v906_v44 = vpack.c.bf16 %v544_v40, %v543_v38  ;;  %v946_v45 = vpack.c.bf16 %v560_v41, %v559_v39  ;;  %v1032_v46 = vpop.f32.mrb[12].mxu0  ;;  %v1048_v47 = vpop.f32.mrb[12].mxu1 }
 0x112   : > { %967 = vst [vmem:[%s1202_s13 + $0x28] sm:$0xff] %v911_v42   ;;  %975 = vst [vmem:[%s1202_s13 + $0x68] sm:$0xff] %v951_v43   ;;  %v465_v48 = vadd.f32 %v1032_v46, %v1187_v24  ;;  %v529_v49 = vadd.f32 %v1048_v47, %v1187_v24  ;;  %v456_v50 = vpop.f32.mrb[13].mxu0  ;;  %v520_v51 = vpop.f32.mrb[13].mxu1 }
 0x113   : > { %966 = vst [vmem:[%s1202_s13 + $0x20] sm:$0xff] %v906_v44   ;;  %974 = vst [vmem:[%s1202_s13 + $0x60] sm:$0xff] %v946_v45   ;;  %v457_v52 = vadd.f32 %v1187_v24, %v456_v50  ;;  %v521_v53 = vadd.f32 %v1187_v24, %v520_v51  ;;  %v1033_v54 = vpop.f32.mrb[14].mxu0  ;;  %v1049_v55 = vpop.f32.mrb[14].mxu1 }
 0x114   : > { %v468_v56 = vadd.f32 %v1033_v54, %v1187_v24  ;;  %v532_v57 = vadd.f32 %v1049_v55, %v1187_v24  ;;  %v459_v58 = vpop.f32.mrb[15].mxu0  ;;  %v523_v59 = vpop.f32.mrb[15].mxu1  ;;  %v549_v62 = vmax.f32 %v465_v48, 0.0  ;;  %v565_v63 = vmax.f32 %v529_v49, 0.0 }
 0x115   : > { %v460_v60 = vadd.f32 %v1187_v24, %v459_v58  ;;  %v524_v61 = vadd.f32 %v1187_v24, %v523_v59  ;;  %v547_v2 = vmax.f32 %v457_v52, 0.0  ;;  %v563_v3 = vmax.f32 %v521_v53, 0.0 }
 0x116   : > { %v550_v0 = vmax.f32 %v468_v56, 0.0  ;;  %v566_v1 = vmax.f32 %v532_v57, 0.0 }
 0x117   : > { %v548_v4 = vmax.f32 %v460_v60, 0.0  ;;  %v564_v5 = vmax.f32 %v524_v61, 0.0 }
 0x118   : > { %v921_v6 = vpack.c.bf16 %v550_v0, %v549_v62  ;;  %v961_v7 = vpack.c.bf16 %v566_v1, %v565_v63 }
 0x119   : > { %v916_v8 = vpack.c.bf16 %v548_v4, %v547_v2  ;;  %v956_v9 = vpack.c.bf16 %v564_v5, %v563_v3 }
 0x11a   : > { %969 = vst [vmem:[%s1202_s13 + $0x38] sm:$0xff] %v921_v6   ;;  %977 = vst [vmem:[%s1202_s13 + $0x78] sm:$0xff] %v961_v7  }
 0x11b   : > { %968 = vst [vmem:[%s1202_s13 + $0x30] sm:$0xff] %v916_v8   ;;  %976 = vst [vmem:[%s1202_s13 + $0x70] sm:$0xff] %v956_v9  }
 0x11c PF: > { %s13_s12 = sadd.s32 1, %s1104_s12  }
 0x11d   : > { %p10_p4 = scmp.ge.s32.totalorder %s13_s12, 4  }
 0x11f   :  { %12 = sbr.rel (!%p10_p4) target bundleno = 1 (0x1), region = 62 }

// kernel: block_b_forward.7
= control target key start
LH: loop header
LB: loop body
LE: loop exit
PB: predicated region body
PF: predicated region fallthrough
CT: control target
= control target key end

     0   :  { %s2540_s12 = smov 0   ;;  %s2929_s0 = inlined_call_operand.vmem [shape: bf16[512,640], index: 0, kind: input, shape index: {}]   ;;  %s2930_s1 = inlined_call_operand.vmem [shape: bf16[640,128], index: 1, kind: input, shape index: {}]   ;;  %s2931_s2 = inlined_call_operand.vmem [shape: f32[1,128], index: 2, kind: input, shape index: {}]   ;;  %s2932_s3 = inlined_call_operand.vmem [shape: bf16[512,128], index: 3, kind: output, shape index: {}]  }
   0x1 LB: > { %s1748_s13 = sadd.s32 4294967295, %s2518_s12   ;;  %p1752_p0 = scmp.ge.s32.totalorder %s2518_s12, 1  ;;  %s2518_s12 = sphi %s2540_s12, %s13_s12  }
   0x2   : > { %p139_p1 = scmp.lt.s32.totalorder %s2518_s12, 3 }
   0x4   : > { %p140_p2 = pnand %p1752_p0, %p139_p1 }
   0x5   : > { %v2360_v0 = vld [vmem:[%s2930_s1 + $0x40] sm:$0xff] (!%p140_p2)   ;;  %s1753_s16 = sshll.u32 (!%p140_p2), %s1748_s13, 5  ;;  %v2362_v2 = vld [vmem:[%s2930_s1 + $0x48] sm:$0xff] (!%p140_p2)   ;;  %v2364_v4 = vld [vmem:[%s2930_s1 + $0x50] sm:$0xff] (!%p140_p2)  }
   0x6   : > { %143 = sbr.rel (%p140_p2) target bundleno = 416 (0x1a0), region = 32  ;;  %v2361_v1 = vld [vmem:[%s2930_s1] sm:$0xff] (!%p140_p2)   ;;  %2039 = vmatprep.subr.bf16.mxu0 (!%p140_p2), %v2360_v0  ;;  %2335 = vmatprep.subr.bf16.mxu1 (!%p140_p2), %v2360_v0  ;;  %p165_p3 = scmp.lt.s32.totalorder (!%p140_p2), %s1753_s16, 63  ;;  %v2363_v3 = vld [vmem:[%s2930_s1 + $0x8] sm:$0xff] (!%p140_p2)   ;;  %v2365_v5 = vld [vmem:[%s2930_s1 + $0x10] sm:$0xff] (!%p140_p2)  }
   0x7   : > { %2040 = vmatpush3.bf16.msra.mxu0 (!%p140_p2), %v2361_v1  ;;  %2343 = vmatpush3.bf16.msra.mxu1 (!%p140_p2), %v2361_v1  ;;  %v2366_v6 = vld [vmem:[%s2930_s1 + $0x58] sm:$0xff] (!%p140_p2)   ;;  %v2368_v8 = vld [vmem:[%s2930_s1 + $0x60] sm:$0xff] (!%p140_p2)   ;;  %v2370_v10 = vld [vmem:[%s2930_s1 + $0x68] sm:$0xff] (!%p140_p2)  }
   0x8   : > { %2041 = vmatprep.subr.bf16.mxu0 (!%p140_p2), %v2362_v2  ;;  %2336 = vmatprep.subr.bf16.mxu1 (!%p140_p2), %v2362_v2  ;;  %v2367_v7 = vld [vmem:[%s2930_s1 + $0x18] sm:$0xff] (!%p140_p2)   ;;  %v2369_v9 = vld [vmem:[%s2930_s1 + $0x20] sm:$0xff] (!%p140_p2)   ;;  %v2371_v13 = vld [vmem:[%s2930_s1 + $0x28] sm:$0xff] (!%p140_p2)  }
   0x9   : > { %v2372_v14 = vld [vmem:[%s2930_s1 + $0x70] sm:$0xff] (!%p140_p2)   ;;  %v2374_v16 = vld [vmem:[%s2930_s1 + $0x78] sm:$0xff] (!%p140_p2)   ;;  %v2382_v18 = vld [vmem:[%s2930_s1 + $0xc0] sm:$0xff] (!%p140_p2)  }
   0xa   : > { %v2373_v15 = vld [vmem:[%s2930_s1 + $0x30] sm:$0xff] (!%p140_p2)   ;;  %v2375_v17 = vld [vmem:[%s2930_s1 + $0x38] sm:$0xff] (!%p140_p2)   ;;  %v2385_v19 = vld [vmem:[%s2930_s1 + $0x100] sm:$0xff] (!%p140_p2)  }
   0xb   : > { %2042 = vmatpush3.bf16.msra.mxu0 (!%p140_p2), %v2363_v3  ;;  %2344 = vmatpush3.bf16.msra.mxu1 (!%p140_p2), %v2363_v3  ;;  %v2383_v22 = vld [vmem:[%s2930_s1 + $0x80] sm:$0xff] (!%p140_p2)   ;;  %v2384_v23 = vld [vmem:[%s2930_s1 + $0xc8] sm:$0xff] (!%p140_p2)   ;;  %v2393_v29 = vld [vmem:[%s2930_s1 + $0xd0] sm:$0xff] (!%p140_p2)  }
   0xc   : > { %2043 = vmatprep.subr.bf16.mxu0 (!%p140_p2), %v2364_v4  ;;  %2337 = vmatprep.subr.bf16.mxu1 (!%p140_p2), %v2364_v4  ;;  %v2404_v26 = vld [vmem:[%s2930_s1 + $0x108] sm:$0xff] (!%p140_p2)   ;;  %v2394_v31 = vld [vmem:[%s2930_s1 + $0x90] sm:$0xff] (!%p140_p2)   ;;  %v2395_v33 = vld [vmem:[%s2930_s1 + $0xd8] sm:$0xff] (!%p140_p2)  }
   0xd   : > { %s2934_s16 = smov (!%p165_p3, %s1753_s16), 63  ;;  %v2386_v27 = vld [vmem:[%s2930_s1 + $0x88] sm:$0xff]   ;;  %v2396_v35 = vld [vmem:[%s2930_s1 + $0x98] sm:$0xff]   ;;  %v2403_v36 = vld [vmem:[%s2930_s1 + $0xe0] sm:$0xff]  }
   0xe   : > { %s2351_s29 = smul.u32 20, %s2934_s16  ;;  %v2417_v38 = vld [vmem:[%s2930_s1 + $0x110] sm:$0xff]   ;;  %v2405_v40 = vld [vmem:[%s2930_s1 + $0xa0] sm:$0xff]   ;;  %v2406_v41 = vld [vmem:[%s2930_s1 + $0xe8] sm:$0xff]   ;;  %s1756_s27 = sshll.u32 %s2934_s16, 2 }
   0xf   : > { %2044 = vmatpush3.bf16.msra.mxu0 %v2365_v5  ;;  %2345 = vmatpush3.bf16.msra.mxu1 %v2365_v5  ;;  %v2407_v44 = vld [vmem:[%s2930_s1 + $0xa8] sm:$0xff]   ;;  %v2431_v45 = vld [vmem:[%s2930_s1 + $0x118] sm:$0xff]   ;;  %v2414_v48 = vld [vmem:[%s2930_s1 + $0xf0] sm:$0xff]   ;;  %s2852_s30 = scalar_lea.vmem %s2932_s3, %s1756_s27 }
  0x10   : > { %2045 = vmatprep.subr.bf16.mxu0 %v2366_v6  ;;  %2338 = vmatprep.subr.bf16.mxu1 %v2366_v6  ;;  %s2581_s9 = scalar_lea.vmem %s2929_s0, %s2351_s29  ;;  %v2415_v49 = vld [vmem:[%s2930_s1 + $0xb0] sm:$0xff]   ;;  %v2416_v50 = vld [vmem:[%s2930_s1 + $0xf8] sm:$0xff]   ;;  %v2438_v52 = vld [vmem:[%s2930_s1 + $0x120] sm:$0xff]  }
  0x11   : > { %v2378_v11 = vld [vmem:[%s2581_s9 + $0x4] ss:$20 sps:$4 sm:$0xff]   ;;  %v2376_v20 = vld [vmem:[%s2581_s9] ss:$20 sps:$4 sm:$0xff]   ;;  %v2391_v28 = vld [vmem:[%s2581_s9 + $0x28] ss:$20 sps:$4 sm:$0xff]  }
  0x12   : > { %v2381_v12 = vld [vmem:[%s2581_s9 + $0x1e4] ss:$20 sps:$4 sm:$0xff]   ;;  %1049 = vmatprep.mubr.bf16.mxu0 %v2378_v11  ;;  %v2379_v21 = vld [vmem:[%s2581_s9 + $0x1e0] ss:$20 sps:$4 sm:$0xff]   ;;  %v2392_v30 = vld [vmem:[%s2581_s9 + $0x208] ss:$20 sps:$4 sm:$0xff]  }
  0x13   : > { %2046 = vmatpush3.bf16.msra.mxu0 %v2367_v7  ;;  %2346 = vmatpush3.bf16.msra.mxu1 %v2367_v7  ;;  %v2387_v24 = vld [vmem:[%s2581_s9 + $0x2c] ss:$20 sps:$4 sm:$0xff]   ;;  %v2397_v32 = vld [vmem:[%s2581_s9 + $0x54] ss:$20 sps:$4 sm:$0xff]   ;;  %v2401_v37 = vld [vmem:[%s2581_s9 + $0x50] ss:$20 sps:$4 sm:$0xff]  }
  0x14   : > { %2047 = vmatprep.subr.bf16.mxu0 %v2368_v8  ;;  %2339 = vmatprep.subr.bf16.mxu1 %v2368_v8  ;;  %v2389_v25 = vld [vmem:[%s2581_s9 + $0x20c] ss:$20 sps:$4 sm:$0xff]   ;;  %v2399_v34 = vld [vmem:[%s2581_s9 + $0x234] ss:$20 sps:$4 sm:$0xff]   ;;  %v2402_v39 = vld [vmem:[%s2581_s9 + $0x230] ss:$20 sps:$4 sm:$0xff]  }
  0x15   : > { %1145 = vmatprep.mubr.bf16.mxu1 %v2381_v12  ;;  %v2408_v42 = vld [vmem:[%s2581_s9 + $0x7c] ss:$20 sps:$4 sm:$0xff]   ;;  %v2412_v46 = vld [vmem:[%s2581_s9 + $0x78] ss:$20 sps:$4 sm:$0xff]   ;;  %v2424_v56 = vld [vmem:[%s2581_s9 + $0xa0] ss:$20 sps:$4 sm:$0xff]  }
  0x16   : > { %v2410_v43 = vld [vmem:[%s2581_s9 + $0x25c] ss:$20 sps:$4 sm:$0xff]   ;;  %v2413_v47 = vld [vmem:[%s2581_s9 + $0x258] ss:$20 sps:$4 sm:$0xff]   ;;  %v2427_v59 = vld [vmem:[%s2581_s9 + $0x34] ss:$20 sps:$4 sm:$0xff]  }
  0x17   : > { %2048 = vmatpush3.bf16.msra.mxu0 %v2369_v9  ;;  %2347 = vmatpush3.bf16.msra.mxu1 %v2369_v9  ;;  %v2419_v51 = vld [vmem:[%s2581_s9 + $0xa4] ss:$20 sps:$4 sm:$0xff]   ;;  %v2423_v53 = vld [vmem:[%s2581_s9 + $0xc] ss:$20 sps:$4 sm:$0xff]   ;;  %v2421_v55 = vld [vmem:[%s2581_s9 + $0x8] ss:$20 sps:$4 sm:$0xff]  }
  0x18   : > { %2049 = vmatprep.subr.bf16.mxu0 %v2370_v10  ;;  %2340 = vmatprep.subr.bf16.mxu1 %v2370_v10  ;;  %v2418_v54 = vld [vmem:[%s2930_s1 + $0xb8] sm:$0xff]   ;;  %v2451_v57 = vld [vmem:[%s2930_s1 + $0x128] sm:$0xff]   ;;  %v2458_v60 = vld [vmem:[%s2930_s1 + $0x130] sm:$0xff]  }
  0x19   : > { %v2425_v58 = vld [vmem:[%s2581_s9 + $0xcc] ss:$20 sps:$4 sm:$0xff]   ;;  %v2429_v61 = vld [vmem:[%s2581_s9 + $0xc8] ss:$20 sps:$4 sm:$0xff]   ;;  %v2430_v62 = vld [vmem:[%s2581_s9 + $0x30] ss:$20 sps:$4 sm:$0xff]  }
  0x1a   : > { %v2432_v63 = vld [vmem:[%s2581_s9 + $0xf4] ss:$20 sps:$4 sm:$0xff]   ;;  %v2434_v0 = vld [vmem:[%s2581_s9 + $0x5c] ss:$20 sps:$4 sm:$0xff]   ;;  %v2437_v3 = vld [vmem:[%s2581_s9 + $0x58] ss:$20 sps:$4 sm:$0xff]  }
  0x1b   : > { %2050 = vmatpush3.bf16.msra.mxu0 %v2371_v13  ;;  %2348 = vmatpush3.bf16.msra.mxu1 %v2371_v13  ;;  %v2471_v1 = vld [vmem:[%s2930_s1 + $0x138] sm:$0xff]   ;;  %v2436_v2 = vld [vmem:[%s2581_s9 + $0xf0] ss:$20 sps:$4 sm:$0xff]   ;;  %v2444_v7 = vld [vmem:[%s2581_s9 + $0x80] ss:$20 sps:$4 sm:$0xff]  }
  0x1c   : > { %2051 = vmatprep.subr.bf16.mxu0 %v2372_v14  ;;  %2341 = vmatprep.subr.bf16.mxu1 %v2372_v14  ;;  %v2439_v4 = vld [vmem:[%s2581_s9 + $0x11c] ss:$20 sps:$4 sm:$0xff]   ;;  %v2441_v5 = vld [vmem:[%s2581_s9 + $0x84] ss:$20 sps:$4 sm:$0xff]   ;;  %v2447_v9 = vld [vmem:[%s2581_s9 + $0xac] ss:$20 sps:$4 sm:$0xff]  }
  0x1d   : > { %v2443_v6 = vld [vmem:[%s2581_s9 + $0x118] ss:$20 sps:$4 sm:$0xff]   ;;  %v2449_v10 = vld [vmem:[%s2581_s9 + $0x140] ss:$20 sps:$4 sm:$0xff]   ;;  %v2450_v11 = vld [vmem:[%s2581_s9 + $0xa8] ss:$20 sps:$4 sm:$0xff]  }
  0x1e   : > { %v2445_v8 = vld [vmem:[%s2581_s9 + $0x144] ss:$20 sps:$4 sm:$0xff]   ;;  %v2452_v12 = vld [vmem:[%s2581_s9 + $0x16c] ss:$20 sps:$4 sm:$0xff]   ;;  %v2454_v13 = vld [vmem:[%s2581_s9 + $0xd4] ss:$20 sps:$4 sm:$0xff]  }
  0x1f   : > { %2052 = vmatpush3.bf16.msra.mxu0 %v2373_v15  ;;  %2349 = vmatpush3.bf16.msra.mxu1 %v2373_v15  ;;  %v2456_v14 = vld [vmem:[%s2581_s9 + $0x168] ss:$20 sps:$4 sm:$0xff]   ;;  %v2457_v15 = vld [vmem:[%s2581_s9 + $0xd0] ss:$20 sps:$4 sm:$0xff]  }
  0x20   : > { %2053 = vmatprep.subr.bf16.mxu0 %v2374_v16  ;;  %2342 = vmatprep.subr.bf16.mxu1 %v2374_v16  ;;  %v2459_v16 = vld [vmem:[%s2581_s9 + $0x194] ss:$20 sps:$4 sm:$0xff]  }
  0x23   : > { %2054 = vmatpush3.bf16.msra.mxu0 %v2375_v17  ;;  %2350 = vmatpush3.bf16.msra.mxu1 %v2375_v17  ;;  %v2461_v17 = vld [vmem:[%s2581_s9 + $0xfc] ss:$20 sps:$4 sm:$0xff]  }
  0x24   : > { %2151 = vmatprep.subr.bf16.mxu1 %v2382_v18  ;;  %2287 = vmatprep.subr.bf16.mxu0 %v2385_v19  ;;  %v2463_v18 = vld [vmem:[%s2581_s9 + $0x190] ss:$20 sps:$4 sm:$0xff]  }
  0x26   : > { %1050 = vmatmul.mubr.bf16.vlgmr.msra.gmra.mrb[0].mxu0 %v2376_v20  ;;  %1146 = vmatmul.mubr.bf16.vlgmr.msra.gmra.mrb[0].mxu1 %v2379_v21  ;;  %v2465_v20 = vld [vmem:[%s2581_s9 + $0x1bc] ss:$20 sps:$4 sm:$0xff]   ;;  %v2467_v21 = vld [vmem:[%s2581_s9 + $0x124] ss:$20 sps:$4 sm:$0xff]  }
  0x27   : > { %2152 = vmatpush3.bf16.msra.mxu1 %v2383_v22  ;;  %2288 = vmatpush3.bf16.msra.mxu0 %v2385_v19  ;;  %v2464_v19 = vld [vmem:[%s2581_s9 + $0xf8] ss:$20 sps:$4 sm:$0xff]  }
  0x28   : > { %2153 = vmatprep.subr.bf16.mxu1 %v2384_v23  ;;  %1057 = vmatprep.mubr.bf16.mxu0 %v2387_v24  ;;  %v2469_v22 = vld [vmem:[%s2581_s9 + $0x1b8] ss:$20 sps:$4 sm:$0xff]   ;;  %v2470_v23 = vld [vmem:[%s2581_s9 + $0x120] ss:$20 sps:$4 sm:$0xff]  }
  0x29   : > { %1153 = vmatprep.mubr.bf16.mxu1 %v2389_v25  ;;  %2289 = vmatprep.subr.bf16.mxu0 %v2404_v26  ;;  %v2472_v24 = vld [vmem:[%s2581_s9 + $0x14c] ss:$20 sps:$4 sm:$0xff]   ;;  %v2474_v25 = vld [vmem:[%s2581_s9 + $0x10] ss:$20 sps:$4 sm:$0xff]  }
  0x2b   : > { %2154 = vmatpush3.bf16.msra.mxu1 %v2386_v27  ;;  %2290 = vmatpush3.bf16.msra.mxu0 %v2404_v26  ;;  %v2475_v26 = vld [vmem:[%s2581_s9 + $0x148] ss:$20 sps:$4 sm:$0xff]   ;;  %v2476_v27 = vld [vmem:[%s2581_s9 + $0x38] ss:$20 sps:$4 sm:$0xff]  }
  0x2c   : > { %2155 = vmatprep.subr.bf16.mxu1 %v2393_v29  ;;  %2291 = vmatprep.subr.bf16.mxu0 %v2417_v38  ;;  %v2479_v29 = vld [vmem:[%s2581_s9 + $0x60] ss:$20 sps:$4 sm:$0xff]  }
  0x2e   : > { %1058 = vmatmul.mubr.bf16.gmra.mrb[4].mxu0 %v2391_v28  ;;  %1154 = vmatmul.mubr.bf16.gmra.mrb[4].mxu1 %v2392_v30  ;;  %v2477_v28 = vld [vmem:[%s2581_s9 + $0x174] ss:$20 sps:$4 sm:$0xff]   ;;  %v2480_v30 = vld [vmem:[%s2581_s9 + $0x170] ss:$20 sps:$4 sm:$0xff]  }
  0x2f   : > { %2156 = vmatpush3.bf16.msra.mxu1 %v2394_v31  ;;  %1065 = vmatprep.mubr.bf16.mxu0 %v2397_v32  ;;  %v2481_v31 = vld [vmem:[%s2581_s9 + $0x88] ss:$20 sps:$4 sm:$0xff]  }
  0x30   : > { %2157 = vmatprep.subr.bf16.mxu1 %v2395_v33  ;;  %1161 = vmatprep.mubr.bf16.mxu1 %v2399_v34  ;;  %v2482_v32 = vld [vmem:[%s2581_s9 + $0x19c] ss:$20 sps:$4 sm:$0xff]   ;;  %v2485_v34 = vld [vmem:[%s2581_s9 + $0x198] ss:$20 sps:$4 sm:$0xff]  }
  0x31   : > { %2292 = vmatpush3.bf16.msra.mxu0 %v2417_v38  ;;  %v2484_v33 = vld [vmem:[%s2581_s9 + $0xb0] ss:$20 sps:$4 sm:$0xff]   ;;  %v2490_v38 = vld [vmem:[%s2581_s9 + $0x1c0] ss:$20 sps:$4 sm:$0xff]  }
  0x32   : > { %2293 = vmatprep.subr.bf16.mxu0 %v2431_v45 }
  0x33   : > { %2158 = vmatpush3.bf16.msra.mxu1 %v2396_v35  ;;  %v2486_v35 = vld [vmem:[%s2581_s9 + $0xd8] ss:$20 sps:$4 sm:$0xff]  }
  0x34   : > { %2159 = vmatprep.subr.bf16.mxu1 %v2403_v36  ;;  %v2487_v36 = vld [vmem:[%s2581_s9 + $0x1c4] ss:$20 sps:$4 sm:$0xff]  }
  0x35   : > { %2294 = vmatpush3.bf16.msra.mxu0 %v2431_v45  ;;  %v2499_v45 = vld [vmem:[%s2581_s9 + $0x1a0] ss:$20 sps:$4 sm:$0xff]  }
  0x36   : > { %1066 = vmatmul.mubr.bf16.gmra.mrb[8].mxu0 %v2401_v37  ;;  %1162 = vmatmul.mubr.bf16.gmra.mrb[8].mxu1 %v2402_v39  ;;  %v2489_v37 = vld [vmem:[%s2581_s9 + $0x100] ss:$20 sps:$4 sm:$0xff]   ;;  %v2491_v39 = vld [vmem:[%s2581_s9 + $0x128] ss:$20 sps:$4 sm:$0xff]  }
  0x37   : > { %2160 = vmatpush3.bf16.msra.mxu1 %v2405_v40  ;;  %1073 = vmatprep.mubr.bf16.mxu0 %v2408_v42  ;;  %v2492_v40 = vld [vmem:[%s2581_s9 + $0x1ec] ss:$20 sps:$4 sm:$0xff]   ;;  %v2495_v42 = vld [vmem:[%s2581_s9 + $0x1e8] ss:$20 sps:$4 sm:$0xff]  }
  0x38   : > { %2161 = vmatprep.subr.bf16.mxu1 %v2406_v41  ;;  %1169 = vmatprep.mubr.bf16.mxu1 %v2410_v43  ;;  %v2494_v41 = vld [vmem:[%s2581_s9 + $0x150] ss:$20 sps:$4 sm:$0xff]   ;;  %v2496_v43 = vld [vmem:[%s2581_s9 + $0x178] ss:$20 sps:$4 sm:$0xff]  }
  0x39   : > { %2295 = vmatprep.subr.bf16.mxu0 %v2438_v52 }
  0x3a   : > { %2296 = vmatpush3.bf16.msra.mxu0 %v2438_v52  ;;  %v2507_v52 = vld [vmem:[%s2581_s9 + $0x264] ss:$20 sps:$4 sm:$0xff]  }
  0x3b   : > { %2162 = vmatpush3.bf16.msra.mxu1 %v2407_v44  ;;  %2297 = vmatprep.subr.bf16.mxu0 %v2451_v57  ;;  %v2497_v44 = vld [vmem:[%s2581_s9 + $0x214] ss:$20 sps:$4 sm:$0xff]  }
  0x3c   : > { %2163 = vmatprep.subr.bf16.mxu1 %v2414_v48  ;;  %v2502_v48 = vld [vmem:[%s2581_s9 + $0x23c] ss:$20 sps:$4 sm:$0xff]  }
  0x3e   : > { %1074 = vmatmul.mubr.bf16.gmra.mrb[12].mxu0 %v2412_v46  ;;  %1170 = vmatmul.mubr.bf16.gmra.mrb[12].mxu1 %v2413_v47  ;;  %v2500_v46 = vld [vmem:[%s2581_s9 + $0x210] ss:$20 sps:$4 sm:$0xff]   ;;  %v2501_v47 = vld [vmem:[%s2581_s9 + $0x1c8] ss:$20 sps:$4 sm:$0xff]  }
  0x3f   : > { %2164 = vmatpush3.bf16.msra.mxu1 %v2415_v49  ;;  %1081 = vmatprep.mubr.bf16.mxu0 %v2419_v51  ;;  %v2504_v49 = vld [vmem:[%s2581_s9 + $0x1f0] ss:$20 sps:$4 sm:$0xff]   ;;  %v2506_v51 = vld [vmem:[%s2581_s9 + $0x218] ss:$20 sps:$4 sm:$0xff]  }
  0x40   : > { %2165 = vmatprep.subr.bf16.mxu1 %v2416_v50  ;;  %1210 = vmatprep.mubr.bf16.mxu1 %v2423_v53  ;;  %v2505_v50 = vld [vmem:[%s2581_s9 + $0x238] ss:$20 sps:$4 sm:$0xff]   ;;  %v2509_v53 = vld [vmem:[%s2581_s9 + $0x240] ss:$20 sps:$4 sm:$0xff]  }
  0x41   : > { %2298 = vmatpush3.bf16.msra.mxu0 %v2451_v57 }
  0x42   : > { %2299 = vmatprep.subr.bf16.mxu0 %v2458_v60 }
  0x43   : > { %2166 = vmatpush3.bf16.msra.mxu1 %v2418_v54  ;;  %v2510_v54 = vld [vmem:[%s2581_s9 + $0x260] ss:$20 sps:$4 sm:$0xff]  }
  0x45   : > { %2300 = vmatpush3.bf16.msra.mxu0 %v2458_v60 }
  0x46   : > { %1082 = vmatmul.mubr.bf16.gmra.mrb[16].mxu0 %v2424_v56  ;;  %1211 = vmatmul.mubr.bf16.vlgmr.msra.gmra.mrb[16].mxu1 %v2421_v55  ;;  %v2511_v55 = vld [vmem:[%s2581_s9 + $0x268] ss:$20 sps:$4 sm:$0xff]  }
  0x47   : > { %1089 = vmatprep.mubr.bf16.mxu0 %v2425_v58  ;;  %1218 = vmatprep.mubr.bf16.mxu1 %v2427_v59 }
  0x48   : > { %2301 = vmatprep.subr.bf16.mxu0 %v2471_v1 }
  0x49   : > { %2302 = vmatpush3.bf16.msra.mxu0 %v2471_v1 }
  0x4e   : > { %1090 = vmatmul.mubr.bf16.gmra.mrb[20].mxu0 %v2429_v61  ;;  %1219 = vmatmul.mubr.bf16.gmra.mrb[20].mxu1 %v2430_v62 }
  0x4f   : > { %1097 = vmatprep.mubr.bf16.mxu0 %v2432_v63  ;;  %1226 = vmatprep.mubr.bf16.mxu1 %v2434_v0 }
  0x56   : > { %1098 = vmatmul.mubr.bf16.gmra.mrb[24].mxu0 %v2436_v2  ;;  %1227 = vmatmul.mubr.bf16.gmra.mrb[24].mxu1 %v2437_v3 }
  0x57   : > { %1105 = vmatprep.mubr.bf16.mxu0 %v2439_v4  ;;  %1234 = vmatprep.mubr.bf16.mxu1 %v2441_v5 }
  0x5e   : > { %1106 = vmatmul.mubr.bf16.gmra.mrb[28].mxu0 %v2443_v6  ;;  %1235 = vmatmul.mubr.bf16.gmra.mrb[28].mxu1 %v2444_v7 }
  0x5f   : > { %1113 = vmatprep.mubr.bf16.mxu0 %v2445_v8  ;;  %1242 = vmatprep.mubr.bf16.mxu1 %v2447_v9 }
  0x66   : > { %1114 = vmatmul.mubr.bf16.gmra.mrb[32].mxu0 %v2449_v10  ;;  %1243 = vmatmul.mubr.bf16.gmra.mrb[32].mxu1 %v2450_v11 }
  0x67   : > { %1121 = vmatprep.mubr.bf16.mxu0 %v2452_v12  ;;  %1250 = vmatprep.mubr.bf16.mxu1 %v2454_v13 }
  0x6e   : > { %1122 = vmatmul.mubr.bf16.gmra.mrb[36].mxu0 %v2456_v14  ;;  %1251 = vmatmul.mubr.bf16.gmra.mrb[36].mxu1 %v2457_v15 }
  0x6f   : > { %1129 = vmatprep.mubr.bf16.mxu0 %v2459_v16  ;;  %1258 = vmatprep.mubr.bf16.mxu1 %v2461_v17 }
  0x76   : > { %1130 = vmatmul.mubr.bf16.gmra.mrb[40].mxu0 %v2463_v18  ;;  %1259 = vmatmul.mubr.bf16.gmra.mrb[40].mxu1 %v2464_v19 }
  0x77   : > { %1137 = vmatprep.mubr.bf16.mxu0 %v2465_v20  ;;  %1266 = vmatprep.mubr.bf16.mxu1 %v2467_v21 }
  0x7e   : > { %1138 = vmatmul.mubr.bf16.gmra.mrb[44].mxu0 %v2469_v22  ;;  %1267 = vmatmul.mubr.bf16.gmra.mrb[44].mxu1 %v2470_v23 }
  0x7f   : > { %1274 = vmatprep.mubr.bf16.mxu1 %v2472_v24  ;;  %2303 = vmatprep.mubr.bf16.mxu0 %v2474_v25 }
  0x86   : > { %1275 = vmatmul.mubr.bf16.gmra.mrb[48].mxu1 %v2475_v26  ;;  %2304 = vmatmul.mubr.bf16.vlgmr.msra.gmra.mrb[48].mxu0 %v2476_v27 }
  0x87   : > { %1282 = vmatprep.mubr.bf16.mxu1 %v2477_v28  ;;  %2307 = vmatprep.mubr.bf16.mxu0 %v2479_v29 }
  0x8e   : > { %1283 = vmatmul.mubr.bf16.gmra.mrb[52].mxu1 %v2480_v30  ;;  %2308 = vmatmul.mubr.bf16.gmra.mrb[52].mxu0 %v2481_v31 }
  0x8f   : > { %1290 = vmatprep.mubr.bf16.mxu1 %v2482_v32  ;;  %2311 = vmatprep.mubr.bf16.mxu0 %v2484_v33 }
  0x96   : > { %1291 = vmatmul.mubr.bf16.gmra.mrb[56].mxu1 %v2485_v34  ;;  %2312 = vmatmul.mubr.bf16.gmra.mrb[56].mxu0 %v2486_v35 }
  0x97   : > { %1298 = vmatprep.mubr.bf16.mxu1 %v2487_v36  ;;  %2315 = vmatprep.mubr.bf16.mxu0 %v2489_v37 }
  0x9e   : > { %1299 = vmatmul.mubr.bf16.gmra.mrb[60].mxu1 %v2490_v38  ;;  %2316 = vmatmul.mubr.bf16.gmra.mrb[60].mxu0 %v2491_v39 }
  0x9f   : > { %1306 = vmatprep.mubr.bf16.mxu1 %v2492_v40  ;;  %2319 = vmatprep.mubr.bf16.mxu0 %v2494_v41 }
  0xa6   : > { %1307 = vmatmul.mubr.bf16.gmra.mrb[64].mxu1 %v2495_v42  ;;  %2320 = vmatmul.mubr.bf16.gmra.mrb[64].mxu0 %v2496_v43  ;;  %v2775_v42 = vld [vmem:[%s2931_s2] ss:$0 sm:$0xff] }
  0xa7   : > { %1314 = vmatprep.mubr.bf16.mxu1 %v2497_v44  ;;  %2323 = vmatprep.mubr.bf16.mxu0 %v2499_v45 }
  0xae   : > { %1315 = vmatmul.mubr.bf16.gmra.mrb[68].mxu1 %v2500_v46  ;;  %2324 = vmatmul.mubr.bf16.gmra.mrb[68].mxu0 %v2501_v47 }
  0xaf   : > { %1322 = vmatprep.mubr.bf16.mxu1 %v2502_v48  ;;  %2327 = vmatprep.mubr.bf16.mxu0 %v2504_v49 }
  0xb6   : > { %1323 = vmatmul.mubr.bf16.gmra.mrb[72].mxu1 %v2505_v50  ;;  %2328 = vmatmul.mubr.bf16.gmra.mrb[72].mxu0 %v2506_v51 }
  0xb7   : > { %1330 = vmatprep.mubr.bf16.mxu1 %v2507_v52  ;;  %2331 = vmatprep.mubr.bf16.mxu0 %v2509_v53 }
  0xbe   : > { %1331 = vmatmul.mubr.bf16.gmra.mrb[76].mxu1 %v2510_v54  ;;  %2332 = vmatmul.mubr.bf16.gmra.mrb[76].mxu0 %v2511_v55 }
  0xf9   : > { %v2127_v56 = vpop.f32.mrb[0].mxu1  ;;  %v2055_v57 = vpop.f32.mrb[0].mxu0 }
  0xfa   : > { %v2128_v58 = vpop.f32.mrb[1].mxu1  ;;  %v2056_v59 = vpop.f32.mrb[1].mxu0 }
  0xfb   : > { %v2756_v60 = vadd.f32 %v2128_v58, %v2127_v56  ;;  %v2130_v61 = vpop.f32.mrb[2].mxu1  ;;  %v2057_v62 = vadd.f32 %v2056_v59, %v2055_v57  ;;  %v2058_v63 = vpop.f32.mrb[2].mxu0 }
  0xfc   : > { %v2131_v0 = vpop.f32.mrb[3].mxu1  ;;  %v2059_v1 = vpop.f32.mrb[3].mxu0 }
  0xfd   : > { %v2758_v2 = vadd.f32 %v2131_v0, %v2130_v61  ;;  %v2060_v3 = vadd.f32 %v2059_v1, %v2058_v63  ;;  %v1052_v45 = vadd.f32 %v2057_v62, %v2775_v42 }
  0xff   : > { %v1055_v52 = vadd.f32 %v2060_v3, %v2775_v42 }
 0x101   : > { %v2133_v4 = vpop.f32.mrb[4].mxu1  ;;  %v2061_v5 = vpop.f32.mrb[4].mxu0 }
 0x102   : > { %v2134_v6 = vpop.f32.mrb[5].mxu1  ;;  %v2062_v7 = vpop.f32.mrb[5].mxu0 }
 0x103   : > { %v2760_v8 = vadd.f32 %v2134_v6, %v2133_v4  ;;  %v2136_v9 = vpop.f32.mrb[6].mxu1  ;;  %v2063_v10 = vadd.f32 %v2062_v7, %v2061_v5  ;;  %v2064_v11 = vpop.f32.mrb[6].mxu0 }
 0x104   : > { %v2137_v12 = vpop.f32.mrb[7].mxu1  ;;  %v2065_v13 = vpop.f32.mrb[7].mxu0 }
 0x105   : > { %v2762_v14 = vadd.f32 %v2137_v12, %v2136_v9  ;;  %v2066_v15 = vadd.f32 %v2065_v13, %v2064_v11  ;;  %v1060_v62 = vadd.f32 %v2063_v10, %v2775_v42 }
 0x107   : > { %v1063_v3 = vadd.f32 %v2066_v15, %v2775_v42 }
 0x109   : > { %v2139_v16 = vpop.f32.mrb[8].mxu1  ;;  %v2067_v17 = vpop.f32.mrb[8].mxu0 }
 0x10a   : > { %v2140_v18 = vpop.f32.mrb[9].mxu1  ;;  %v2068_v19 = vpop.f32.mrb[9].mxu0 }
 0x10b   : > { %v2764_v20 = vadd.f32 %v2140_v18, %v2139_v16  ;;  %v2142_v21 = vpop.f32.mrb[10].mxu1  ;;  %v2069_v22 = vadd.f32 %v2068_v19, %v2067_v17  ;;  %v2070_v23 = vpop.f32.mrb[10].mxu0 }
 0x10c   : > { %v2143_v24 = vpop.f32.mrb[11].mxu1  ;;  %v2071_v25 = vpop.f32.mrb[11].mxu0 }
 0x10d   : > { %v2766_v26 = vadd.f32 %v2143_v24, %v2142_v21  ;;  %v2072_v27 = vadd.f32 %v2071_v25, %v2070_v23  ;;  %v1068_v10 = vadd.f32 %v2069_v22, %v2775_v42 }
 0x10f   : > { %v1071_v15 = vadd.f32 %v2072_v27, %v2775_v42 }
 0x111   : > { %v2145_v28 = vpop.f32.mrb[12].mxu1  ;;  %v2073_v29 = vpop.f32.mrb[12].mxu0 }
 0x112   : > { %v2146_v30 = vpop.f32.mrb[13].mxu1  ;;  %v2074_v31 = vpop.f32.mrb[13].mxu0 }
 0x113   : > { %v2768_v32 = vadd.f32 %v2146_v30, %v2145_v28  ;;  %v2148_v33 = vpop.f32.mrb[14].mxu1  ;;  %v2075_v34 = vadd.f32 %v2074_v31, %v2073_v29  ;;  %v2076_v35 = vpop.f32.mrb[14].mxu0 }
 0x114   : > { %v2149_v36 = vpop.f32.mrb[15].mxu1  ;;  %v2077_v37 = vpop.f32.mrb[15].mxu0 }
 0x115   : > { %v2770_v38 = vadd.f32 %v2149_v36, %v2148_v33  ;;  %v2078_v39 = vadd.f32 %v2077_v37, %v2076_v35  ;;  %v1076_v22 = vadd.f32 %v2075_v34, %v2775_v42 }
 0x117   : > { %v1079_v27 = vadd.f32 %v2078_v39, %v2775_v42 }
 0x119   : > { %v2167_v40 = vpop.f32.mrb[16].mxu1  ;;  %v2079_v41 = vpop.f32.mrb[16].mxu0 }
 0x11a   : > { %v2168_v43 = vpop.f32.mrb[17].mxu1  ;;  %v2080_v44 = vpop.f32.mrb[17].mxu0 }
 0x11b   : > { %v2169_v46 = vadd.f32 %v2168_v43, %v2167_v40  ;;  %v2170_v47 = vpop.f32.mrb[18].mxu1  ;;  %v2081_v48 = vadd.f32 %v2080_v44, %v2079_v41  ;;  %v2082_v49 = vpop.f32.mrb[18].mxu0 }
 0x11c   : > { %v2171_v50 = vpop.f32.mrb[19].mxu1  ;;  %v2083_v51 = vpop.f32.mrb[19].mxu0 }
 0x11d   : > { %v2172_v53 = vadd.f32 %v2171_v50, %v2170_v47  ;;  %v2084_v54 = vadd.f32 %v2083_v51, %v2082_v49  ;;  %v2779_v55 = vadd.f32 %v2169_v46, %v1052_v45  ;;  %v1084_v34 = vadd.f32 %v2081_v48, %v2775_v42 }
 0x11f   : > { %v2781_v56 = vadd.f32 %v2172_v53, %v1055_v52  ;;  %v1087_v39 = vadd.f32 %v2084_v54, %v2775_v42 }
 0x121   : > { %v2173_v57 = vpop.f32.mrb[20].mxu1  ;;  %v2085_v58 = vpop.f32.mrb[20].mxu0 }
 0x122   : > { %v2174_v59 = vpop.f32.mrb[21].mxu1  ;;  %v2086_v61 = vpop.f32.mrb[21].mxu0 }
 0x123   : > { %v2175_v63 = vadd.f32 %v2174_v59, %v2173_v57  ;;  %v2176_v0 = vpop.f32.mrb[22].mxu1  ;;  %v2087_v1 = vadd.f32 %v2086_v61, %v2085_v58  ;;  %v2088_v4 = vpop.f32.mrb[22].mxu0 }
 0x124   : > { %v2177_v5 = vpop.f32.mrb[23].mxu1  ;;  %v2089_v6 = vpop.f32.mrb[23].mxu0 }
 0x125   : > { %v2178_v7 = vadd.f32 %v2177_v5, %v2176_v0  ;;  %v2090_v9 = vadd.f32 %v2089_v6, %v2088_v4  ;;  %v2785_v11 = vadd.f32 %v2175_v63, %v1060_v62  ;;  %v1092_v48 = vadd.f32 %v2087_v1, %v2775_v42 }
 0x127   : > { %v2787_v12 = vadd.f32 %v2178_v7, %v1063_v3 }
 0x129   : > { %v2179_v13 = vpop.f32.mrb[24].mxu1  ;;  %v2091_v16 = vpop.f32.mrb[24].mxu0 }
 0x12a   : > { %v2180_v17 = vpop.f32.mrb[25].mxu1  ;;  %v2092_v18 = vpop.f32.mrb[25].mxu0 }
 0x12b   : > { %v2181_v19 = vadd.f32 %v2180_v17, %v2179_v13  ;;  %v2182_v21 = vpop.f32.mrb[26].mxu1  ;;  %v2093_v23 = vadd.f32 %v2092_v18, %v2091_v16  ;;  %v2094_v24 = vpop.f32.mrb[26].mxu0 }
 0x12c   : > { %v2183_v25 = vpop.f32.mrb[27].mxu1  ;;  %v2095_v28 = vpop.f32.mrb[27].mxu0 }
 0x12d   : > { %v2184_v29 = vadd.f32 %v2183_v25, %v2182_v21  ;;  %v2096_v30 = vadd.f32 %v2095_v28, %v2094_v24  ;;  %v2791_v31 = vadd.f32 %v2181_v19, %v1068_v10 }
 0x12f   : > { %v2793_v33 = vadd.f32 %v2184_v29, %v1071_v15  ;;  %v1095_v15 = vadd.f32 %v2090_v9, %v2775_v42 }
 0x131   : > { %v2185_v35 = vpop.f32.mrb[28].mxu1  ;;  %v2097_v36 = vpop.f32.mrb[28].mxu0 }
 0x132   : > { %v2186_v37 = vpop.f32.mrb[29].mxu1  ;;  %v2098_v40 = vpop.f32.mrb[29].mxu0 }
 0x133   : > { %v2187_v41 = vadd.f32 %v2186_v37, %v2185_v35  ;;  %v2188_v43 = vpop.f32.mrb[30].mxu1  ;;  %v2099_v44 = vadd.f32 %v2098_v40, %v2097_v36  ;;  %v2100_v45 = vpop.f32.mrb[30].mxu0 }
 0x134   : > { %v2189_v46 = vpop.f32.mrb[31].mxu1  ;;  %v2101_v47 = vpop.f32.mrb[31].mxu0 }
 0x135   : > { %v2190_v49 = vadd.f32 %v2189_v46, %v2188_v43  ;;  %v2102_v50 = vadd.f32 %v2101_v47, %v2100_v45  ;;  %v2797_v51 = vadd.f32 %v2187_v41, %v1076_v22  ;;  %v1100_v43 = vadd.f32 %v2093_v23, %v2775_v42 }
 0x137   : > { %v2799_v52 = vadd.f32 %v2190_v49, %v1079_v27 }
 0x139   : > { %v2191_v53 = vpop.f32.mrb[32].mxu1  ;;  %v2103_v57 = vpop.f32.mrb[32].mxu0 }
 0x13a   : > { %v2192_v58 = vpop.f32.mrb[33].mxu1  ;;  %v2104_v59 = vpop.f32.mrb[33].mxu0 }
 0x13b   : > { %v2193_v61 = vadd.f32 %v2192_v58, %v2191_v53  ;;  %v2194_v62 = vpop.f32.mrb[34].mxu1  ;;  %v2105_v63 = vadd.f32 %v2104_v59, %v2103_v57  ;;  %v2106_v0 = vpop.f32.mrb[34].mxu0  ;;  %v1103_v53 = vadd.f32 %v2096_v30, %v2775_v42 }
 0x13c   : > { %v2195_v4 = vpop.f32.mrb[35].mxu1  ;;  %v2107_v5 = vpop.f32.mrb[35].mxu0 }
 0x13d   : > { %v2196_v6 = vadd.f32 %v2195_v4, %v2194_v62  ;;  %v2803_v3 = vadd.f32 %v2107_v5, %v2106_v0  ;;  %v2805_v7 = vadd.f32 %v2193_v61, %v1084_v34  ;;  %v1108_v4 = vadd.f32 %v2099_v44, %v2775_v42 }
 0x13f   : > { %v2807_v13 = vadd.f32 %v2196_v6, %v1087_v39 }
 0x141   : > { %v2197_v16 = vpop.f32.mrb[36].mxu1  ;;  %v2109_v17 = vpop.f32.mrb[36].mxu0 }
 0x142   : > { %v2198_v18 = vpop.f32.mrb[37].mxu1  ;;  %v2110_v10 = vpop.f32.mrb[37].mxu0 }
 0x143   : > { %v2199_v19 = vadd.f32 %v2198_v18, %v2197_v16  ;;  %v2200_v21 = vpop.f32.mrb[38].mxu1  ;;  %v2810_v24 = vadd.f32 %v2110_v10, %v2109_v17  ;;  %v2112_v25 = vpop.f32.mrb[38].mxu0  ;;  %v1111_v18 = vadd.f32 %v2102_v50, %v2775_v42 }
 0x144   : > { %v2201_v28 = vpop.f32.mrb[39].mxu1  ;;  %v2113_v54 = vpop.f32.mrb[39].mxu0 }
 0x145   : > { %v2202_v29 = vadd.f32 %v2201_v28, %v2200_v21  ;;  %v2813_v35 = vadd.f32 %v2113_v54, %v2112_v25  ;;  %v2815_v36 = vadd.f32 %v2199_v19, %v1092_v48 }
 0x147   : > { %v2817_v37 = vadd.f32 %v2202_v29, %v1095_v15  ;;  %v1116_v29 = vadd.f32 %v2105_v63, %v2775_v42 }
 0x149   : > { %v2203_v40 = vpop.f32.mrb[40].mxu1  ;;  %v2115_v22 = vpop.f32.mrb[40].mxu0 }
 0x14a   : > { %v2204_v41 = vpop.f32.mrb[41].mxu1  ;;  %v2116_v1 = vpop.f32.mrb[41].mxu0 }
 0x14b   : > { %v2205_v45 = vadd.f32 %v2204_v41, %v2203_v40  ;;  %v2206_v46 = vpop.f32.mrb[42].mxu1  ;;  %v2820_v47 = vadd.f32 %v2116_v1, %v2115_v22  ;;  %v2118_v27 = vpop.f32.mrb[42].mxu0 }
 0x14c   : > { %v2207_v49 = vpop.f32.mrb[43].mxu1  ;;  %v2119_v9 = vpop.f32.mrb[43].mxu0 }
 0x14d   : > { %v2208_v57 = vadd.f32 %v2207_v49, %v2206_v46  ;;  %v2823_v58 = vadd.f32 %v2119_v9, %v2118_v27  ;;  %v2825_v59 = vadd.f32 %v2205_v45, %v1100_v43  ;;  %v1119_v46 = vadd.f32 %v2803_v3, %v2775_v42 }
 0x14f   : > { %v2827_v34 = vadd.f32 %v2208_v57, %v1103_v53 }
 0x151   : > { %v2209_v61 = vpop.f32.mrb[44].mxu1  ;;  %v2121_v62 = vpop.f32.mrb[44].mxu0 }
 0x152   : > { %v2210_v0 = vpop.f32.mrb[45].mxu1  ;;  %v2122_v23 = vpop.f32.mrb[45].mxu0 }
 0x153   : > { %v2211_v5 = vadd.f32 %v2210_v0, %v2209_v61  ;;  %v2212_v39 = vpop.f32.mrb[46].mxu1  ;;  %v2830_v6 = vadd.f32 %v2122_v23, %v2121_v62  ;;  %v2124_v16 = vpop.f32.mrb[46].mxu0 }
 0x154   : > { %v2213_v17 = vpop.f32.mrb[47].mxu1  ;;  %v2125_v30 = vpop.f32.mrb[47].mxu0 }
 0x155   : > { %v2214_v10 = vadd.f32 %v2213_v17, %v2212_v39  ;;  %v2833_v48 = vadd.f32 %v2125_v30, %v2124_v16  ;;  %v2835_v19 = vadd.f32 %v2211_v5, %v1108_v4  ;;  %v1124_v4 = vadd.f32 %v2810_v24, %v2775_v42 }
 0x157   : > { %v2837_v21 = vadd.f32 %v2214_v10, %v1111_v18 }
 0x159   : > { %v2215_v25 = vpop.f32.mrb[48].mxu1  ;;  %v2305_v28 = vpop.f32.mrb[48].mxu0 }
 0x15a   : > { %v1382_v44 = vadd.f32 %v2305_v28, %v2785_v11  ;;  %v2216_v54 = vpop.f32.mrb[49].mxu1  ;;  %v1373_v15 = vpop.f32.mrb[49].mxu0 }
 0x15b   : > { %v2217_v40 = vadd.f32 %v2216_v54, %v2215_v25  ;;  %v1374_v22 = vadd.f32 %v1373_v15, %v2779_v55  ;;  %v2218_v41 = vpop.f32.mrb[50].mxu1  ;;  %v2306_v50 = vpop.f32.mrb[50].mxu0  ;;  %v1127_v25 = vadd.f32 %v2813_v35, %v2775_v42 }
 0x15c   : > { %v1385_v1 = vadd.f32 %v2306_v50, %v2787_v12  ;;  %v2219_v43 = vpop.f32.mrb[51].mxu1  ;;  %v1376_v45 = vpop.f32.mrb[51].mxu0  ;;  %v1502_v9 = vmax.f32 %v1382_v44, 0.0 }
 0x15d   : > { %v2220_v27 = vadd.f32 %v2219_v43, %v2218_v41  ;;  %v1377_v11 = vadd.f32 %v1376_v45, %v2781_v56  ;;  %v2847_v49 = vadd.f32 %v2217_v40, %v1116_v29  ;;  %v1500_v53 = vmax.f32 %v1374_v22, 0.0 }
 0x15e   : > { %v1503_v63 = vmax.f32 %v1385_v1, 0.0 }
 0x15f   : > { %v1501_v55 = vmax.f32 %v1377_v11, 0.0  ;;  %v2854_v12 = vadd.f32 %v2220_v27, %v1119_v46 }
 0x160   : > { %v1952_v57 = vpack.c.bf16 %v1503_v63, %v1502_v9 }
 0x161   : > { %v1947_v3 = vpack.c.bf16 %v1501_v55, %v1500_v53  ;;  %v2221_v61 = vpop.f32.mrb[52].mxu1  ;;  %v2309_v62 = vpop.f32.mrb[52].mxu0  ;;  %v1135_v53 = vadd.f32 %v2823_v58, %v2775_v42 }
 0x162   : > { %2024 = vst [vmem:[%s2852_s30 + $0x8] sm:$0xff] %v1952_v57   ;;  %v1398_v56 = vadd.f32 %v2309_v62, %v2797_v51  ;;  %v2222_v0 = vpop.f32.mrb[53].mxu1  ;;  %v1389_v23 = vpop.f32.mrb[53].mxu0 }
 0x163   : > { %1948 = vst [vmem:[%s2852_s30] sm:$0xff] %v1947_v3   ;;  %v2223_v5 = vadd.f32 %v2222_v0, %v2221_v61  ;;  %v1390_v39 = vadd.f32 %v1389_v23, %v2791_v31  ;;  %v2224_v16 = vpop.f32.mrb[54].mxu1  ;;  %v2310_v17 = vpop.f32.mrb[54].mxu0 }
 0x164   : > { %v1401_v30 = vadd.f32 %v2310_v17, %v2799_v52  ;;  %v2225_v18 = vpop.f32.mrb[55].mxu1  ;;  %v1392_v10 = vpop.f32.mrb[55].mxu0  ;;  %v1506_v24 = vmax.f32 %v1398_v56, 0.0 }
 0x165   : > { %v2226_v51 = vadd.f32 %v2225_v18, %v2224_v16  ;;  %v1393_v28 = vadd.f32 %v1392_v10, %v2793_v33  ;;  %v2866_v44 = vadd.f32 %v2223_v5, %v1124_v4  ;;  %v1504_v15 = vmax.f32 %v1390_v39, 0.0 }
 0x166   : > { %v1507_v54 = vmax.f32 %v1401_v30, 0.0  ;;  %v1132_v33 = vadd.f32 %v2820_v47, %v2775_v42 }
 0x167   : > { %v1505_v31 = vmax.f32 %v1393_v28, 0.0  ;;  %v2868_v29 = vadd.f32 %v2226_v51, %v1127_v25  ;;  %v1143_v51 = vadd.f32 %v2833_v48, %v2775_v42  ;;  %v1148_v48 = vadd.f32 %v2756_v60, %v2775_v42 }
 0x168   : > { %v1962_v40 = vpack.c.bf16 %v1507_v54, %v1506_v24 }
 0x169   : > { %v1957_v52 = vpack.c.bf16 %v1505_v31, %v1504_v15  ;;  %v2227_v22 = vpop.f32.mrb[56].mxu1  ;;  %v2313_v41 = vpop.f32.mrb[56].mxu0 }
 0x16a   : > { %2026 = vst [vmem:[%s2852_s30 + $0x18] sm:$0xff] %v1962_v40   ;;  %v1414_v50 = vadd.f32 %v2313_v41, %v2815_v36  ;;  %v2228_v35 = vpop.f32.mrb[57].mxu1  ;;  %v1405_v1 = vpop.f32.mrb[57].mxu0 }
 0x16b   : > { %2025 = vst [vmem:[%s2852_s30 + $0x10] sm:$0xff] %v1957_v52   ;;  %v2229_v43 = vadd.f32 %v2228_v35, %v2227_v22  ;;  %v1406_v45 = vadd.f32 %v1405_v1, %v2805_v7  ;;  %v2230_v46 = vpop.f32.mrb[58].mxu1  ;;  %v2314_v27 = vpop.f32.mrb[58].mxu0 }
 0x16c   : > { %v1417_v11 = vadd.f32 %v2314_v27, %v2817_v37  ;;  %v2231_v9 = vpop.f32.mrb[59].mxu1  ;;  %v1408_v63 = vpop.f32.mrb[59].mxu0  ;;  %v1510_v47 = vmax.f32 %v1414_v50, 0.0 }
 0x16d   : > { %v2232_v36 = vadd.f32 %v2231_v9, %v2230_v46  ;;  %v1409_v55 = vadd.f32 %v1408_v63, %v2807_v13  ;;  %v2880_v57 = vadd.f32 %v2229_v43, %v1132_v33  ;;  %v1508_v61 = vmax.f32 %v1406_v45, 0.0 }
 0x16e   : > { %v1511_v3 = vmax.f32 %v1417_v11, 0.0  ;;  %v1140_v13 = vadd.f32 %v2830_v6, %v2775_v42  ;;  %v1151_v11 = vadd.f32 %v2758_v2, %v2775_v42  ;;  %v1156_v2 = vadd.f32 %v2760_v8, %v2775_v42 }
 0x16f   : > { %v1509_v7 = vmax.f32 %v1409_v55, 0.0  ;;  %v2882_v62 = vadd.f32 %v2232_v36, %v1135_v53 }
 0x170   : > { %v1972_v56 = vpack.c.bf16 %v1511_v3, %v1510_v47 }
 0x171   : > { %v1967_v37 = vpack.c.bf16 %v1509_v7, %v1508_v61  ;;  %v2233_v0 = vpop.f32.mrb[60].mxu1  ;;  %v2317_v23 = vpop.f32.mrb[60].mxu0 }
 0x172   : > { %2028 = vst [vmem:[%s2852_s30 + $0x28] sm:$0xff] %v1972_v56   ;;  %v1430_v4 = vadd.f32 %v2317_v23, %v2835_v19  ;;  %v2234_v58 = vpop.f32.mrb[61].mxu1  ;;  %v1421_v5 = vpop.f32.mrb[61].mxu0 }
 0x173   : > { %2027 = vst [vmem:[%s2852_s30 + $0x20] sm:$0xff] %v1967_v37   ;;  %v2235_v39 = vadd.f32 %v2234_v58, %v2233_v0  ;;  %v1422_v16 = vadd.f32 %v1421_v5, %v2825_v59  ;;  %v2236_v17 = vpop.f32.mrb[62].mxu1  ;;  %v2318_v30 = vpop.f32.mrb[62].mxu0 }
 0x174   : > { %v1433_v18 = vadd.f32 %v2318_v30, %v2837_v21  ;;  %v2237_v10 = vpop.f32.mrb[63].mxu1  ;;  %v1424_v25 = vpop.f32.mrb[63].mxu0  ;;  %v1514_v6 = vmax.f32 %v1430_v4, 0.0 }
 0x175   : > { %v2238_v19 = vadd.f32 %v2237_v10, %v2236_v17  ;;  %v1425_v28 = vadd.f32 %v1424_v25, %v2827_v34  ;;  %v1301_v24 = vadd.f32 %v2235_v39, %v1140_v13  ;;  %v1512_v15 = vmax.f32 %v1422_v16, 0.0 }
 0x176   : > { %v1515_v54 = vmax.f32 %v1433_v18, 0.0  ;;  %v1159_v39 = vadd.f32 %v2762_v14, %v2775_v42  ;;  %v1164_v14 = vadd.f32 %v2764_v20, %v2775_v42 }
 0x177   : > { %v1513_v31 = vmax.f32 %v1425_v28, 0.0  ;;  %v1304_v59 = vadd.f32 %v2238_v19, %v1143_v51 }
 0x178   : > { %v1982_v40 = vpack.c.bf16 %v1515_v54, %v1514_v6 }
 0x179   : > { %v1977_v52 = vpack.c.bf16 %v1513_v31, %v1512_v15  ;;  %v2239_v22 = vpop.f32.mrb[64].mxu1  ;;  %v2321_v21 = vpop.f32.mrb[64].mxu0 }
 0x17a   : > { %2030 = vst [vmem:[%s2852_s30 + $0x38] sm:$0xff] %v1982_v40   ;;  %v1446_v41 = vadd.f32 %v2321_v21, %v2866_v44  ;;  %v2240_v50 = vpop.f32.mrb[65].mxu1  ;;  %v1437_v35 = vpop.f32.mrb[65].mxu0 }
 0x17b   : > { %2029 = vst [vmem:[%s2852_s30 + $0x30] sm:$0xff] %v1977_v52   ;;  %v2241_v34 = vadd.f32 %v2240_v50, %v2239_v22  ;;  %v1438_v1 = vadd.f32 %v1437_v35, %v2847_v49  ;;  %v2242_v33 = vpop.f32.mrb[66].mxu1  ;;  %v2322_v43 = vpop.f32.mrb[66].mxu0 }
 0x17c   : > { %v1449_v45 = vadd.f32 %v2322_v43, %v2868_v29  ;;  %v2243_v46 = vpop.f32.mrb[67].mxu1  ;;  %v1440_v27 = vpop.f32.mrb[67].mxu0  ;;  %v1518_v60 = vmax.f32 %v1446_v41, 0.0  ;;  %v1167_v41 = vadd.f32 %v2766_v26, %v2775_v42 }
 0x17d   : > { %v2244_v44 = vadd.f32 %v2243_v46, %v2242_v33  ;;  %v1441_v9 = vadd.f32 %v1440_v27, %v2854_v12  ;;  %v1309_v63 = vadd.f32 %v2241_v34, %v1148_v48  ;;  %v1516_v36 = vmax.f32 %v1438_v1, 0.0 }
 0x17e   : > { %v1519_v53 = vmax.f32 %v1449_v45, 0.0 }
 0x17f   : > { %v1517_v55 = vmax.f32 %v1441_v9, 0.0  ;;  %v1312_v49 = vadd.f32 %v2244_v44, %v1151_v11 }
 0x180   : > { %v1992_v47 = vpack.c.bf16 %v1519_v53, %v1518_v60 }
 0x181   : > { %v1987_v3 = vpack.c.bf16 %v1517_v55, %v1516_v36  ;;  %v2245_v61 = vpop.f32.mrb[68].mxu1  ;;  %v2325_v29 = vpop.f32.mrb[68].mxu0 }
 0x182   : > { %2032 = vst [vmem:[%s2852_s30 + $0x48] sm:$0xff] %v1992_v47   ;;  %v1462_v7 = vadd.f32 %v2325_v29, %v1301_v24  ;;  %v2246_v56 = vpop.f32.mrb[69].mxu1  ;;  %v1453_v37 = vpop.f32.mrb[69].mxu0  ;;  %v1175_v47 = vadd.f32 %v2770_v38, %v2775_v42 }
 0x183   : > { %2031 = vst [vmem:[%s2852_s30 + $0x40] sm:$0xff] %v1987_v3   ;;  %v2247_v12 = vadd.f32 %v2246_v56, %v2245_v61  ;;  %v1454_v0 = vadd.f32 %v1453_v37, %v2880_v57  ;;  %v2248_v23 = vpop.f32.mrb[70].mxu1  ;;  %v2326_v4 = vpop.f32.mrb[70].mxu0 }
 0x184   : > { %v1465_v58 = vadd.f32 %v2326_v4, %v1304_v59  ;;  %v2249_v5 = vpop.f32.mrb[71].mxu1  ;;  %v1456_v13 = vpop.f32.mrb[71].mxu0  ;;  %v1522_v18 = vmax.f32 %v1462_v7, 0.0 }
 0x185   : > { %v2250_v16 = vadd.f32 %v2249_v5, %v2248_v23  ;;  %v1457_v17 = vadd.f32 %v1456_v13, %v2882_v62  ;;  %v1317_v30 = vadd.f32 %v2247_v12, %v1156_v2  ;;  %v1520_v10 = vmax.f32 %v1454_v0, 0.0 }
 0x186   : > { %v1523_v8 = vmax.f32 %v1465_v58, 0.0 }
 0x187   : > { %v1521_v25 = vmax.f32 %v1457_v17, 0.0  ;;  %v1320_v51 = vadd.f32 %v2250_v16, %v1159_v39 }
 0x188   : > { %v2002_v57 = vpack.c.bf16 %v1523_v8, %v1522_v18 }
 0x189   : > { %v1997_v19 = vpack.c.bf16 %v1521_v25, %v1520_v10  ;;  %v2251_v28 = vpop.f32.mrb[72].mxu1  ;;  %v2329_v24 = vpop.f32.mrb[72].mxu0 }
 0x18a   : > { %2034 = vst [vmem:[%s2852_s30 + $0x58] sm:$0xff] %v2002_v57   ;;  %v1478_v6 = vadd.f32 %v2329_v24, %v1317_v30  ;;  %v2252_v54 = vpop.f32.mrb[73].mxu1  ;;  %v1469_v15 = vpop.f32.mrb[73].mxu0 }
 0x18b   : > { %2033 = vst [vmem:[%s2852_s30 + $0x50] sm:$0xff] %v1997_v19   ;;  %v2253_v62 = vadd.f32 %v2252_v54, %v2251_v28  ;;  %v1470_v31 = vadd.f32 %v1469_v15, %v1309_v63  ;;  %v2254_v59 = vpop.f32.mrb[74].mxu1  ;;  %v2330_v40 = vpop.f32.mrb[74].mxu0  ;;  %v1172_v63 = vadd.f32 %v2768_v32, %v2775_v42 }
 0x18c   : > { %v1481_v52 = vadd.f32 %v2330_v40, %v1320_v51  ;;  %v2255_v22 = vpop.f32.mrb[75].mxu1  ;;  %v1472_v21 = vpop.f32.mrb[75].mxu0  ;;  %v1526_v34 = vmax.f32 %v1478_v6, 0.0 }
 0x18d   : > { %v2256_v50 = vadd.f32 %v2255_v22, %v2254_v59  ;;  %v1473_v35 = vadd.f32 %v1472_v21, %v1312_v49  ;;  %v1325_v48 = vadd.f32 %v2253_v62, %v1164_v14  ;;  %v1524_v33 = vmax.f32 %v1470_v31, 0.0 }
 0x18e   : > { %v1527_v1 = vmax.f32 %v1481_v52, 0.0 }
 0x18f   : > { %v1525_v20 = vmax.f32 %v1473_v35, 0.0  ;;  %v1328_v43 = vadd.f32 %v2256_v50, %v1167_v41 }
 0x190   : > { %v2012_v45 = vpack.c.bf16 %v1527_v1, %v1526_v34 }
 0x191   : > { %v2007_v46 = vpack.c.bf16 %v1525_v20, %v1524_v33  ;;  %v2257_v27 = vpop.f32.mrb[76].mxu1  ;;  %v2333_v11 = vpop.f32.mrb[76].mxu0 }
 0x192   : > { %2036 = vst [vmem:[%s2852_s30 + $0x68] sm:$0xff] %v2012_v45   ;;  %v2258_v44 = vpop.f32.mrb[77].mxu1  ;;  %v1485_v9 = vpop.f32.mrb[77].mxu0 }
 0x193   : > { %2035 = vst [vmem:[%s2852_s30 + $0x60] sm:$0xff] %v2007_v46   ;;  %v2259_v26 = vadd.f32 %v2258_v44, %v2257_v27  ;;  %v1486_v60 = vadd.f32 %v1485_v9, %v1325_v48  ;;  %v2260_v53 = vpop.f32.mrb[78].mxu1  ;;  %v2334_v36 = vpop.f32.mrb[78].mxu0 }
 0x194   : > { %v2261_v55 = vpop.f32.mrb[79].mxu1  ;;  %v1488_v49 = vpop.f32.mrb[79].mxu0 }
 0x195   : > { %v1333_v3 = vadd.f32 %v2259_v26, %v1172_v63  ;;  %v2262_v61 = vadd.f32 %v2261_v55, %v2260_v53  ;;  %v1489_v29 = vadd.f32 %v1488_v49, %v1328_v43  ;;  %v1528_v56 = vmax.f32 %v1486_v60, 0.0 }
 0x197   : > { %v1494_v7 = vadd.f32 %v2333_v11, %v1333_v3  ;;  %v1336_v37 = vadd.f32 %v2262_v61, %v1175_v47  ;;  %v1529_v2 = vmax.f32 %v1489_v29, 0.0 }
 0x199   : > { %v1497_v32 = vadd.f32 %v2334_v36, %v1336_v37  ;;  %v2017_v12 = vpack.c.bf16 %v1529_v2, %v1528_v56  ;;  %v1530_v0 = vmax.f32 %v1494_v7, 0.0 }
 0x19b   : > { %v1531_v23 = vmax.f32 %v1497_v32, 0.0  ;;  %2037 = vst [vmem:[%s2852_s30 + $0x70] sm:$0xff] %v2017_v12  }
 0x19d   : > { %v2022_v4 = vpack.c.bf16 %v1531_v23, %v1530_v0 }
 0x19f   : > { %2038 = vst [vmem:[%s2852_s30 + $0x78] sm:$0xff] %v2022_v4  }
 0x1a0 PF: > { %s13_s12 = sadd.s32 1, %s2518_s12  }
 0x1a1   : > { %p10_p4 = scmp.ge.s32.totalorder %s13_s12, 4  }
 0x1a3   :  { %12 = sbr.rel (!%p10_p4) target bundleno = 1 (0x1), region = 62 }

// kernel: block_b_forward.8
= control target key start
LH: loop header
LB: loop body
LE: loop exit
PB: predicated region body
PF: predicated region fallthrough
CT: control target
= control target key end

     0   :  { %s1500_s12 = smov 0   ;;  %s1728_s0 = inlined_call_operand.vmem [shape: bf16[112,896], index: 0, kind: input, shape index: {}]   ;;  %s1729_s1 = inlined_call_operand.vmem [shape: bf16[896,128], index: 1, kind: input, shape index: {}]   ;;  %s1730_s2 = inlined_call_operand.vmem [shape: f32[1,128], index: 2, kind: input, shape index: {}]   ;;  %s1731_s3 = inlined_call_operand.vmem [shape: f32[112,128], index: 3, kind: output, shape index: {}]  }
   0x1 LB: > { %s1120_s13 = sadd.s32 4294967295, %s1478_s12   ;;  %p1124_p0 = scmp.ge.s32.totalorder %s1478_s12, 1  ;;  %s1478_s12 = sphi %s1500_s12, %s13_s12  }
   0x2   : > { %p139_p1 = scmp.lt.s32.totalorder %s1478_s12, 3 }
   0x4   : > { %p140_p2 = pnand %p1124_p0, %p139_p1 }
   0x5   : > { %v1379_v0 = vld [vmem:[%s1729_s1 + $0x40] sm:$0xff] (!%p140_p2)   ;;  %v1383_v4 = vld [vmem:[%s1729_s1 + $0x48] sm:$0xff] (!%p140_p2)   ;;  %v1387_v8 = vld [vmem:[%s1729_s1 + $0x50] sm:$0xff] (!%p140_p2)   ;;  %s164_s15 = smul.u32 (!%p140_p2), 7, %s1120_s13 }
   0x6   : > { %143 = sbr.rel (%p140_p2) target bundleno = 316 (0x13c), region = 32  ;;  %v1380_v1 = vld [vmem:[%s1729_s1] sm:$0xff] (!%p140_p2)   ;;  %1214 = vmatprep.subr.bf16.mxu0 (!%p140_p2), %v1379_v0  ;;  %v1384_v5 = vld [vmem:[%s1729_s1 + $0x8] sm:$0xff] (!%p140_p2)   ;;  %v1388_v9 = vld [vmem:[%s1729_s1 + $0x10] sm:$0xff] (!%p140_p2)  }
   0x7   : > { %v1381_v2 = vld [vmem:[%s1729_s1 + $0xc0] sm:$0xff] (!%p140_p2)   ;;  %1215 = vmatpush3.bf16.msra.mxu0 (!%p140_p2), %v1380_v1  ;;  %v1385_v6 = vld [vmem:[%s1729_s1 + $0xc8] sm:$0xff] (!%p140_p2)   ;;  %v1389_v10 = vld [vmem:[%s1729_s1 + $0xd0] sm:$0xff] (!%p140_p2)   ;;  %p165_p3 = scmp.lt.s32.totalorder (!%p140_p2), %s164_s15, 13 }
   0x8   : > { %v1382_v3 = vld [vmem:[%s1729_s1 + $0x80] sm:$0xff] (!%p140_p2)   ;;  %1254 = vmatprep.subr.bf16.mxu1 (!%p140_p2), %v1381_v2  ;;  %1216 = vmatprep.subr.bf16.mxu0 (!%p140_p2), %v1383_v4  ;;  %v1386_v7 = vld [vmem:[%s1729_s1 + $0x88] sm:$0xff] (!%p140_p2)   ;;  %v1390_v11 = vld [vmem:[%s1729_s1 + $0x90] sm:$0xff] (!%p140_p2)  }
   0x9   : > { %1255 = vmatpush3.bf16.msra.mxu1 (!%p140_p2), %v1382_v3  ;;  %v1391_v12 = vld [vmem:[%s1729_s1 + $0x58] sm:$0xff] (!%p140_p2)   ;;  %v1395_v16 = vld [vmem:[%s1729_s1 + $0x60] sm:$0xff] (!%p140_p2)   ;;  %v1399_v20 = vld [vmem:[%s1729_s1 + $0x68] sm:$0xff] (!%p140_p2)  }
   0xa   : > { %1256 = vmatprep.subr.bf16.mxu1 (!%p140_p2), %v1385_v6  ;;  %v1392_v13 = vld [vmem:[%s1729_s1 + $0x18] sm:$0xff] (!%p140_p2)   ;;  %v1396_v17 = vld [vmem:[%s1729_s1 + $0x20] sm:$0xff] (!%p140_p2)   ;;  %v1400_v21 = vld [vmem:[%s1729_s1 + $0x28] sm:$0xff] (!%p140_p2)  }
   0xb   : > { %1217 = vmatpush3.bf16.msra.mxu0 (!%p140_p2), %v1384_v5  ;;  %v1393_v14 = vld [vmem:[%s1729_s1 + $0xd8] sm:$0xff] (!%p140_p2)   ;;  %v1397_v18 = vld [vmem:[%s1729_s1 + $0xe0] sm:$0xff] (!%p140_p2)   ;;  %v1401_v22 = vld [vmem:[%s1729_s1 + $0xe8] sm:$0xff] (!%p140_p2)  }
   0xc   : > { %1218 = vmatprep.subr.bf16.mxu0 (!%p140_p2), %v1387_v8  ;;  %v1394_v15 = vld [vmem:[%s1729_s1 + $0x98] sm:$0xff] (!%p140_p2)   ;;  %v1398_v19 = vld [vmem:[%s1729_s1 + $0xa0] sm:$0xff] (!%p140_p2)   ;;  %v1402_v23 = vld [vmem:[%s1729_s1 + $0xa8] sm:$0xff] (!%p140_p2)  }
   0xd   : > { %1257 = vmatpush3.bf16.msra.mxu1 %v1386_v7  ;;  %s1733_s15 = smov (!%p165_p3, %s164_s15), 13  ;;  %v1403_v24 = vld [vmem:[%s1729_s1 + $0x70] sm:$0xff]   ;;  %v1407_v28 = vld [vmem:[%s1729_s1 + $0x78] sm:$0xff]   ;;  %v1414_v34 = vld [vmem:[%s1729_s1 + $0x140] sm:$0xff]  }
   0xe   : > { %1258 = vmatprep.subr.bf16.mxu1 %v1389_v10  ;;  %s1370_s14 = smul.u32 28, %s1733_s15  ;;  %v1404_v25 = vld [vmem:[%s1729_s1 + $0x30] sm:$0xff]   ;;  %v1408_v29 = vld [vmem:[%s1729_s1 + $0x38] sm:$0xff]   ;;  %v1418_v37 = vld [vmem:[%s1729_s1 + $0x100] sm:$0xff]  }
   0xf   : > { %1219 = vmatpush3.bf16.msra.mxu0 %v1388_v9  ;;  %v1405_v26 = vld [vmem:[%s1729_s1 + $0xf0] sm:$0xff]   ;;  %v1409_v30 = vld [vmem:[%s1729_s1 + $0xf8] sm:$0xff]   ;;  %v1419_v38 = vld [vmem:[%s1729_s1 + $0x148] sm:$0xff]  }
  0x10   : > { %1220 = vmatprep.subr.bf16.mxu0 %v1391_v12  ;;  %v1406_v27 = vld [vmem:[%s1729_s1 + $0xb0] sm:$0xff]   ;;  %s1601_s25 = scalar_lea.vmem %s1728_s0, %s1370_s14  ;;  %v1413_v33 = vld [vmem:[%s1729_s1 + $0xb8] sm:$0xff]   ;;  %v1420_v39 = vld [vmem:[%s1729_s1 + $0x180] sm:$0xff]  }
  0x11   : > { %1259 = vmatpush3.bf16.msra.mxu1 %v1390_v11  ;;  %v1410_v31 = vld [vmem:[%s1601_s25] ss:$28 sps:$4 sm:$0xff]   ;;  %v1415_v35 = vld [vmem:[%s1601_s25 + $0x8] ss:$28 sps:$4 sm:$0xff]   ;;  %v1424_v42 = vld [vmem:[%s1601_s25 + $0x38] ss:$28 sps:$4 sm:$0xff]  }
  0x12   : > { %1260 = vmatprep.subr.bf16.mxu1 %v1393_v14  ;;  %v1412_v32 = vld [vmem:[%s1601_s25 + $0x4] ss:$28 sps:$4 sm:$0xff]   ;;  %v1417_v36 = vld [vmem:[%s1601_s25 + $0xc] ss:$28 sps:$4 sm:$0xff]   ;;  %v1422_v41 = vld [vmem:[%s1601_s25 + $0x3c] ss:$28 sps:$4 sm:$0xff]  }
  0x13   : > { %1221 = vmatpush3.bf16.msra.mxu0 %v1392_v13  ;;  %826 = vmatprep.mubr.bf16.mxu0 %v1412_v32  ;;  %v1421_v40 = vld [vmem:[%s1729_s1 + $0x108] sm:$0xff]   ;;  %v1425_v43 = vld [vmem:[%s1729_s1 + $0x150] sm:$0xff]   ;;  %v1427_v45 = vld [vmem:[%s1601_s25 + $0x44] ss:$28 sps:$4 sm:$0xff]  }
  0x14   : > { %1222 = vmatprep.subr.bf16.mxu0 %v1395_v16  ;;  %890 = vmatprep.mubr.bf16.mxu1 %v1417_v36  ;;  %v1426_v44 = vld [vmem:[%s1729_s1 + $0x188] sm:$0xff]   ;;  %v1429_v46 = vld [vmem:[%s1729_s1 + $0x110] sm:$0xff]   ;;  %v1430_v47 = vld [vmem:[%s1601_s25 + $0x40] ss:$28 sps:$4 sm:$0xff]  }
  0x15   : > { %1261 = vmatpush3.bf16.msra.mxu1 %v1394_v15  ;;  %v1431_v48 = vld [vmem:[%s1729_s1 + $0x158] sm:$0xff]   ;;  %v1432_v49 = vld [vmem:[%s1729_s1 + $0x190] sm:$0xff]   ;;  %v1437_v53 = vld [vmem:[%s1729_s1 + $0x160] sm:$0xff]  }
  0x16   : > { %1262 = vmatprep.subr.bf16.mxu1 %v1397_v18  ;;  %v1433_v50 = vld [vmem:[%s1729_s1 + $0x118] sm:$0xff]   ;;  %v1434_v51 = vld [vmem:[%s1601_s25 + $0x74] ss:$28 sps:$4 sm:$0xff]   ;;  %v1441_v56 = vld [vmem:[%s1729_s1 + $0x120] sm:$0xff]  }
  0x17   : > { %1223 = vmatpush3.bf16.msra.mxu0 %v1396_v17  ;;  %v1436_v52 = vld [vmem:[%s1601_s25 + $0x70] ss:$28 sps:$4 sm:$0xff]   ;;  %v1438_v54 = vld [vmem:[%s1729_s1 + $0x198] sm:$0xff]   ;;  %v1444_v59 = vld [vmem:[%s1729_s1 + $0x1a0] sm:$0xff]  }
  0x18   : > { %1224 = vmatprep.subr.bf16.mxu0 %v1399_v20  ;;  %v1439_v55 = vld [vmem:[%s1601_s25 + $0x7c] ss:$28 sps:$4 sm:$0xff]   ;;  %v1443_v58 = vld [vmem:[%s1729_s1 + $0x168] sm:$0xff]   ;;  %v1448_v0 = vld [vmem:[%s1729_s1 + $0x170] sm:$0xff]  }
  0x19   : > { %1263 = vmatpush3.bf16.msra.mxu1 %v1398_v19  ;;  %v1442_v57 = vld [vmem:[%s1601_s25 + $0x78] ss:$28 sps:$4 sm:$0xff]   ;;  %v1445_v60 = vld [vmem:[%s1729_s1 + $0x128] sm:$0xff]   ;;  %v1465_v17 = vld [vmem:[%s1601_s25 + $0x84] ss:$28 sps:$4 sm:$0xff]  }
  0x1a   : > { %1264 = vmatprep.subr.bf16.mxu1 %v1401_v22  ;;  %v202_v61 = vld [vmem:[%s1601_s25 + $0xa8] sm:$0xff]  ;;  %v203_v2 = vld [vmem:[%s1601_s25 + $0xb0] sm:$0xff]  ;;  %v1453_v6 = vld [vmem:[%s1729_s1 + $0x178] sm:$0xff]  }
  0x1b   : > { %1225 = vmatpush3.bf16.msra.mxu0 %v1400_v21  ;;  %v1150_v62 = vcombine.high %v202_v61, %v202_v61  ;;  %v1149_v63 = vcombine.low %v202_v61, %v202_v61  ;;  %v1449_v1 = vld [vmem:[%s1729_s1 + $0x1a8] sm:$0xff]   ;;  %v1152_v3 = vcombine.high %v203_v2, %v203_v2  ;;  %v1451_v4 = vld [vmem:[%s1729_s1 + $0x130] sm:$0xff]   ;;  %v1151_v5 = vcombine.low %v203_v2, %v203_v2  ;;  %v1455_v8 = vld [vmem:[%s1729_s1 + $0x138] sm:$0xff]  }
  0x1c   : > { %1226 = vmatprep.subr.bf16.mxu0 %v1403_v24  ;;  %v1454_v7 = vld [vmem:[%s1729_s1 + $0x1b0] sm:$0xff]   ;;  %v1459_v11 = vld [vmem:[%s1729_s1 + $0x1b8] sm:$0xff]   ;;  %v1462_v13 = vld [vmem:[%s1601_s25 + $0x4c] ss:$28 sps:$4 sm:$0xff]  }
  0x1d   : > { %1265 = vmatpush3.bf16.msra.mxu1 %v1402_v23  ;;  %v1456_v9 = vld [vmem:[%s1601_s25 + $0x10] ss:$28 sps:$4 sm:$0xff]   ;;  %v1460_v12 = vld [vmem:[%s1601_s25 + $0x18] ss:$28 sps:$4 sm:$0xff]   ;;  %v1468_v15 = vld [vmem:[%s1601_s25 + $0x88] ss:$28 sps:$4 sm:$0xff]  }
  0x1e   : > { %1266 = vmatprep.subr.bf16.mxu1 %v1405_v26  ;;  %v1458_v10 = vld [vmem:[%s1601_s25 + $0x14] ss:$28 sps:$4 sm:$0xff]   ;;  %v1464_v16 = vld [vmem:[%s1601_s25 + $0x48] ss:$28 sps:$4 sm:$0xff]   ;;  %v1469_v18 = vld [vmem:[%s1601_s25 + $0xc0] ss:$0 sps:$4 sm:$0xff]  }
  0x1f   : > { %1227 = vmatpush3.bf16.msra.mxu0 %v1404_v25  ;;  %v1461_v14 = vld [vmem:[%s1601_s25 + $0x50] ss:$28 sps:$4 sm:$0xff]   ;;  %v204_v19 = vld [vmem:[%s1601_s25 + $0xb8] sm:$0xff]  ;;  %v1127_v24 = vld [vmem:[%s1730_s2] ss:$0 sm:$0xff] }
  0x20   : > { %1228 = vmatprep.subr.bf16.mxu0 %v1407_v28  ;;  %v1467_v20 = vld [vmem:[%s1601_s25 + $0x80] ss:$28 sps:$4 sm:$0xff]   ;;  %v1154_v21 = vcombine.high %v204_v19, %v204_v19  ;;  %v1153_v22 = vcombine.low %v204_v19, %v204_v19  ;;  %s1126_s25 = sshll.u32 %s1733_s15, 3 }
  0x21   : > { %1267 = vmatpush3.bf16.msra.mxu1 %v1406_v27  ;;  %s1716_s9 = scalar_lea.vmem %s1731_s3, %s1126_s25 }
  0x22   : > { %1268 = vmatprep.subr.bf16.mxu1 %v1409_v30 }
  0x23   : > { %1229 = vmatpush3.bf16.msra.mxu0 %v1408_v29 }
  0x24   : > { %1294 = vmatprep.subr.bf16.mxu0 %v1414_v34 }
  0x25   : > { %1269 = vmatpush3.bf16.msra.mxu1 %v1413_v33 }
  0x26   : > { %827 = vmatmul.mubr.bf16.vlgmr.msra.gmra.mrb[0].mxu0 %v1410_v31  ;;  %1346 = vmatprep.subr.bf16.mxu1 %v1420_v39 }
  0x27   : > { %1295 = vmatpush3.bf16.msra.mxu0 %v1418_v37  ;;  %834 = vmatprep.mubr.bf16.mxu0 %v1422_v41 }
  0x28   : > { %891 = vmatmul.mubr.bf16.vlgmr.msra.gmra.mrb[0].mxu1 %v1415_v35  ;;  %1296 = vmatprep.subr.bf16.mxu0 %v1419_v38 }
  0x29   : > { %1347 = vmatpush3.bf16.msra.mxu1 %v1420_v39  ;;  %898 = vmatprep.mubr.bf16.mxu1 %v1427_v45 }
  0x2a   : > { %1348 = vmatprep.subr.bf16.mxu1 %v1426_v44 }
  0x2b   : > { %1297 = vmatpush3.bf16.msra.mxu0 %v1421_v40 }
  0x2c   : > { %1298 = vmatprep.subr.bf16.mxu0 %v1425_v43 }
  0x2d   : > { %1349 = vmatpush3.bf16.msra.mxu1 %v1426_v44 }
  0x2e   : > { %835 = vmatmul.mubr.bf16.gmra.mrb[4].mxu0 %v1424_v42  ;;  %1350 = vmatprep.subr.bf16.mxu1 %v1432_v49 }
  0x2f   : > { %1299 = vmatpush3.bf16.msra.mxu0 %v1429_v46  ;;  %842 = vmatprep.mubr.bf16.mxu0 %v1434_v51 }
  0x30   : > { %899 = vmatmul.mubr.bf16.gmra.mrb[4].mxu1 %v1430_v47  ;;  %1300 = vmatprep.subr.bf16.mxu0 %v1431_v48 }
  0x31   : > { %1351 = vmatpush3.bf16.msra.mxu1 %v1432_v49  ;;  %906 = vmatprep.mubr.bf16.mxu1 %v1439_v55 }
  0x32   : > { %1352 = vmatprep.subr.bf16.mxu1 %v1438_v54 }
  0x33   : > { %1301 = vmatpush3.bf16.msra.mxu0 %v1433_v50 }
  0x34   : > { %1302 = vmatprep.subr.bf16.mxu0 %v1437_v53 }
  0x35   : > { %1353 = vmatpush3.bf16.msra.mxu1 %v1438_v54 }
  0x36   : > { %843 = vmatmul.mubr.bf16.gmra.mrb[8].mxu0 %v1436_v52  ;;  %1354 = vmatprep.subr.bf16.mxu1 %v1444_v59 }
  0x37   : > { %1303 = vmatpush3.bf16.msra.mxu0 %v1441_v56  ;;  %850 = vmatprep.mubr.bf16.mxu0 %v1150_v62 }
  0x38   : > { %907 = vmatmul.mubr.bf16.gmra.mrb[8].mxu1 %v1442_v57  ;;  %1304 = vmatprep.subr.bf16.mxu0 %v1443_v58 }
  0x39   : > { %1355 = vmatpush3.bf16.msra.mxu1 %v1444_v59  ;;  %914 = vmatprep.mubr.bf16.mxu1 %v1152_v3 }
  0x3a   : > { %1356 = vmatprep.subr.bf16.mxu1 %v1449_v1 }
  0x3b   : > { %1305 = vmatpush3.bf16.msra.mxu0 %v1445_v60 }
  0x3c   : > { %1306 = vmatprep.subr.bf16.mxu0 %v1448_v0 }
  0x3d   : > { %1357 = vmatpush3.bf16.msra.mxu1 %v1449_v1 }
  0x3e   : > { %851 = vmatmul.mubr.bf16.gmra.mrb[12].mxu0 %v1149_v63  ;;  %1358 = vmatprep.subr.bf16.mxu1 %v1454_v7 }
  0x3f   : > { %1307 = vmatpush3.bf16.msra.mxu0 %v1451_v4  ;;  %954 = vmatprep.mubr.bf16.mxu0 %v1458_v10 }
  0x40   : > { %915 = vmatmul.mubr.bf16.gmra.mrb[12].mxu1 %v1151_v5  ;;  %1308 = vmatprep.subr.bf16.mxu0 %v1453_v6 }
  0x41   : > { %1359 = vmatpush3.bf16.msra.mxu1 %v1454_v7  ;;  %1362 = vmatprep.mubr.bf16.mxu1 %v1460_v12 }
  0x42   : > { %1360 = vmatprep.subr.bf16.mxu1 %v1459_v11 }
  0x43   : > { %1309 = vmatpush3.bf16.msra.mxu0 %v1455_v8 }
  0x45   : > { %1361 = vmatpush3.bf16.msra.mxu1 %v1459_v11 }
  0x46   : > { %955 = vmatmul.mubr.bf16.vlgmr.msra.gmra.mrb[16].mxu0 %v1456_v9 }
  0x47   : > { %962 = vmatprep.mubr.bf16.mxu0 %v1462_v13 }
  0x48   : > { %1363 = vmatmul.mubr.bf16.vlgmr.msra.gmra.mrb[16].mxu1 %v1461_v14 }
  0x49   : > { %1366 = vmatprep.mubr.bf16.mxu1 %v1468_v15 }
  0x4e   : > { %963 = vmatmul.mubr.bf16.gmra.mrb[20].mxu0 %v1464_v16 }
  0x4f   : > { %970 = vmatprep.mubr.bf16.mxu0 %v1465_v17 }
  0x50   : > { %1367 = vmatmul.mubr.bf16.gmra.mrb[20].mxu1 %v1469_v18 }
  0x56   : > { %971 = vmatmul.mubr.bf16.gmra.mrb[24].mxu0 %v1467_v20 }
  0x57   : > { %978 = vmatprep.mubr.bf16.mxu0 %v1154_v21 }
  0x5e   : > { %979 = vmatmul.mubr.bf16.gmra.mrb[28].mxu0 %v1153_v22 }
  0xf9   : > { %v1230_v23 = vpop.f32.mrb[0].mxu0 }
  0xfa   : > { %v1231_v25 = vpop.f32.mrb[1].mxu0 }
  0xfb   : > { %v1232_v26 = vadd.f32 %v1231_v25, %v1230_v23  ;;  %v1233_v27 = vpop.f32.mrb[2].mxu0  ;;  %v1270_v28 = vpop.f32.mrb[0].mxu1 }
  0xfc   : > { %v1234_v29 = vpop.f32.mrb[3].mxu0  ;;  %v1271_v32 = vpop.f32.mrb[1].mxu1 }
  0xfd   : > { %v829_v30 = vadd.f32 %v1232_v26, %v1127_v24  ;;  %v1235_v31 = vadd.f32 %v1234_v29, %v1233_v27  ;;  %v1272_v33 = vadd.f32 %v1271_v32, %v1270_v28  ;;  %v1273_v34 = vpop.f32.mrb[2].mxu1 }
  0xfe   : > { %v1274_v36 = vpop.f32.mrb[3].mxu1 }
  0xff   : > { %v832_v35 = vadd.f32 %v1235_v31, %v1127_v24  ;;  %v893_v37 = vadd.f32 %v1272_v33, %v829_v30  ;;  %v1275_v38 = vadd.f32 %v1274_v36, %v1273_v34 }
 0x101   : > { %v1236_v39 = vpop.f32.mrb[4].mxu0  ;;  %v896_v40 = vadd.f32 %v1275_v38, %v832_v35 }
 0x102   : > { %v1237_v41 = vpop.f32.mrb[5].mxu0 }
 0x103   : > { %v1238_v42 = vadd.f32 %v1237_v41, %v1236_v39  ;;  %v1239_v43 = vpop.f32.mrb[6].mxu0  ;;  %v1276_v46 = vpop.f32.mrb[4].mxu1 }
 0x104   : > { %v1240_v44 = vpop.f32.mrb[7].mxu0  ;;  %v1277_v48 = vpop.f32.mrb[5].mxu1 }
 0x105   : > { %v837_v45 = vadd.f32 %v1238_v42, %v1127_v24  ;;  %v1241_v47 = vadd.f32 %v1240_v44, %v1239_v43  ;;  %v1278_v50 = vadd.f32 %v1277_v48, %v1276_v46  ;;  %v1279_v51 = vpop.f32.mrb[6].mxu1 }
 0x106   : > { %v1280_v52 = vpop.f32.mrb[7].mxu1 }
 0x107   : > { %v840_v49 = vadd.f32 %v1241_v47, %v1127_v24  ;;  %v901_v53 = vadd.f32 %v1278_v50, %v837_v45  ;;  %v1281_v54 = vadd.f32 %v1280_v52, %v1279_v51 }
 0x109   : > { %v1242_v55 = vpop.f32.mrb[8].mxu0  ;;  %v904_v56 = vadd.f32 %v1281_v54, %v840_v49 }
 0x10a   : > { %v1243_v57 = vpop.f32.mrb[9].mxu0 }
 0x10b   : > { %v1244_v58 = vadd.f32 %v1243_v57, %v1242_v55  ;;  %v1245_v59 = vpop.f32.mrb[10].mxu0  ;;  %v1282_v60 = vpop.f32.mrb[8].mxu1 }
 0x10c   : > { %v1246_v61 = vpop.f32.mrb[11].mxu0  ;;  %v1283_v0 = vpop.f32.mrb[9].mxu1 }
 0x10d   : > { %v845_v62 = vadd.f32 %v1244_v58, %v1127_v24  ;;  %v1247_v63 = vadd.f32 %v1246_v61, %v1245_v59  ;;  %v1284_v1 = vadd.f32 %v1283_v0, %v1282_v60  ;;  %v1285_v2 = vpop.f32.mrb[10].mxu1 }
 0x10e   : > { %v1286_v4 = vpop.f32.mrb[11].mxu1 }
 0x10f   : > { %v848_v3 = vadd.f32 %v1247_v63, %v1127_v24  ;;  %v909_v5 = vadd.f32 %v1284_v1, %v845_v62  ;;  %v1287_v6 = vadd.f32 %v1286_v4, %v1285_v2 }
 0x111   : > { %v912_v7 = vadd.f32 %v1287_v6, %v848_v3  ;;  %v1248_v8 = vpop.f32.mrb[12].mxu0 }
 0x112   : > { %v1249_v9 = vpop.f32.mrb[13].mxu0 }
 0x113   : > { %v1250_v10 = vadd.f32 %v1249_v9, %v1248_v8  ;;  %v1251_v11 = vpop.f32.mrb[14].mxu0  ;;  %v1288_v12 = vpop.f32.mrb[12].mxu1 }
 0x114   : > { %v1252_v13 = vpop.f32.mrb[15].mxu0  ;;  %v1289_v14 = vpop.f32.mrb[13].mxu1 }
 0x115   : > { %v853_v15 = vadd.f32 %v1250_v10, %v1127_v24  ;;  %v1290_v16 = vadd.f32 %v1289_v14, %v1288_v12  ;;  %v1291_v17 = vpop.f32.mrb[14].mxu1 }
 0x116   : > { %v1292_v18 = vpop.f32.mrb[15].mxu1 }
 0x117   : > { %v917_v19 = vadd.f32 %v1290_v16, %v853_v15 }
 0x119   : > { %v1310_v20 = vpop.f32.mrb[16].mxu0 }
 0x11a   : > { %v1311_v21 = vpop.f32.mrb[17].mxu0 }
 0x11b   : > { %v1312_v22 = vadd.f32 %v1311_v21, %v1310_v20  ;;  %v1313_v23 = vpop.f32.mrb[18].mxu0  ;;  %v1364_v26 = vpop.f32.mrb[16].mxu1 }
 0x11c   : > { %v1314_v25 = vpop.f32.mrb[19].mxu0  ;;  %v1020_v29 = vpop.f32.mrb[17].mxu1 }
 0x11d   : > { %v1315_v27 = vadd.f32 %v1314_v25, %v1313_v23  ;;  %v957_v28 = vadd.f32 %v1312_v22, %v893_v37  ;;  %v1365_v30 = vpop.f32.mrb[18].mxu1 }
 0x11e   : > { %v1023_v33 = vpop.f32.mrb[19].mxu1 }
 0x11f   : > { %v1021_v31 = vadd.f32 %v1020_v29, %v957_v28  ;;  %v960_v32 = vadd.f32 %v1315_v27, %v896_v40 }
 0x121   : > { %v1050_v24 = vmax.f32 %v1021_v31, 0.0  ;;  %v1024_v34 = vadd.f32 %v1023_v33, %v960_v32  ;;  %v1316_v35 = vpop.f32.mrb[20].mxu0 }
 0x122   : > { %v1317_v36 = vpop.f32.mrb[21].mxu0 }
 0x123   : > { %1057 = vst [vmem:[%s1716_s9] sm:$0xff] %v1050_v24  ;;  %v1051_v38 = vmax.f32 %v1024_v34, 0.0  ;;  %v1318_v39 = vadd.f32 %v1317_v36, %v1316_v35  ;;  %v1319_v37 = vpop.f32.mrb[22].mxu0  ;;  %v1368_v42 = vpop.f32.mrb[20].mxu1 }
 0x124   : > { %v1320_v41 = vpop.f32.mrb[23].mxu0  ;;  %v1036_v44 = vpop.f32.mrb[21].mxu1 }
 0x125   : > { %1058 = vst [vmem:[%s1716_s9 + $0x8] sm:$0xff] %v1051_v38  ;;  %v965_v40 = vadd.f32 %v1318_v39, %v901_v53  ;;  %v1321_v43 = vadd.f32 %v1320_v41, %v1319_v37  ;;  %v1369_v45 = vpop.f32.mrb[22].mxu1 }
 0x126   : > { %v1039_v48 = vpop.f32.mrb[23].mxu1 }
 0x127   : > { %v1029_v46 = vadd.f32 %v1364_v26, %v965_v40  ;;  %v968_v47 = vadd.f32 %v1321_v43, %v904_v56 }
 0x129   : > { %v1052_v49 = vmax.f32 %v1029_v46, 0.0  ;;  %v1032_v50 = vadd.f32 %v1365_v30, %v968_v47  ;;  %v1322_v51 = vpop.f32.mrb[24].mxu0 }
 0x12a   : > { %v1323_v52 = vpop.f32.mrb[25].mxu0 }
 0x12b   : > { %1059 = vst [vmem:[%s1716_s9 + $0x10] sm:$0xff] %v1052_v49  ;;  %v1053_v54 = vmax.f32 %v1032_v50, 0.0  ;;  %v1324_v55 = vadd.f32 %v1323_v52, %v1322_v51  ;;  %v1325_v57 = vpop.f32.mrb[26].mxu0 }
 0x12c   : > { %v1326_v58 = vpop.f32.mrb[27].mxu0 }
 0x12d   : > { %1060 = vst [vmem:[%s1716_s9 + $0x18] sm:$0xff] %v1053_v54  ;;  %v1327_v53 = vadd.f32 %v1326_v58, %v1325_v57  ;;  %v973_v59 = vadd.f32 %v1324_v55, %v909_v5 }
 0x12f   : > { %v1037_v60 = vadd.f32 %v1036_v44, %v973_v59  ;;  %v976_v61 = vadd.f32 %v1327_v53, %v912_v7 }
 0x131   : > { %v1054_v62 = vmax.f32 %v1037_v60, 0.0  ;;  %v1040_v56 = vadd.f32 %v1039_v48, %v976_v61  ;;  %v1328_v63 = vpop.f32.mrb[28].mxu0 }
 0x132   : > { %v1329_v0 = vpop.f32.mrb[29].mxu0 }
 0x133   : > { %1061 = vst [vmem:[%s1716_s9 + $0x20] sm:$0xff] %v1054_v62  ;;  %v1055_v1 = vmax.f32 %v1040_v56, 0.0  ;;  %v1330_v2 = vadd.f32 %v1329_v0, %v1328_v63  ;;  %v1331_v3 = vpop.f32.mrb[30].mxu0 }
 0x134   : > { %v1332_v4 = vpop.f32.mrb[31].mxu0 }
 0x135   : > { %1062 = vst [vmem:[%s1716_s9 + $0x28] sm:$0xff] %v1055_v1  ;;  %v981_v6 = vadd.f32 %v1330_v2, %v917_v19 }
 0x137   : > { %v1045_v8 = vadd.f32 %v1368_v42, %v981_v6 }
 0x139   : > { %v1056_v9 = vmax.f32 %v1045_v8, 0.0 }
 0x13b   : > { %1063 = vst [vmem:[%s1716_s9 + $0x30] sm:$0xff] %v1056_v9 }
 0x13c PF: > { %s13_s12 = sadd.s32 1, %s1478_s12  }
 0x13d   : > { %p10_p4 = scmp.ge.s32.totalorder %s13_s12, 4  }
 0x13f   :  { %12 = sbr.rel (!%p10_p4) target bundleno = 1 (0x1), region = 62 }

// kernel: block_b_forward.5
= control target key start
LH: loop header
LB: loop body
LE: loop exit
PB: predicated region body
PF: predicated region fallthrough
CT: control target
= control target key end

     0   :  { %s766_s12 = smov 0   ;;  %s913_s0 = inlined_call_operand.vmem [shape: bf16[112,128], index: 0, kind: input, shape index: {}]   ;;  %s914_s1 = inlined_call_operand.vmem [shape: bf16[128,384], index: 1, kind: input, shape index: {}]   ;;  %s915_s2 = inlined_call_operand.vmem [shape: f32[1,384], index: 2, kind: input, shape index: {}]   ;;  %s916_s3 = inlined_call_operand.vmem [shape: f32[112,384], index: 3, kind: output, shape index: {}]  }
   0x1 LB: > { %s618_s13 = sadd.s32 4294967295, %s743_s12   ;;  %p622_p0 = scmp.ge.s32.totalorder %s743_s12, 1  ;;  %s743_s12 = sphi %s766_s12, %s13_s12  }
   0x2   : > { %p138_p1 = scmp.lt.s32.totalorder %s743_s12, 3 }
   0x4   : > { %p139_p2 = pnand %p622_p0, %p138_p1 }
   0x5   : > { %v701_v0 = vld [vmem:[%s914_s1 + $0x4] ss:$12 sps:$4 sm:$0xff] (!%p139_p2)   ;;  %s163_s16 = smul.u32 (!%p139_p2), 7, %s618_s13  ;;  %v703_v1 = vld [vmem:[%s914_s1] ss:$12 sps:$4 sm:$0xff] (!%p139_p2)   ;;  %v745_v2 = vmov (!%p139_p2), 0   ;;  %v218_v29 = vlaneseq (!%p139_p2) }
   0x6   : > { %142 = sbr.rel (%p139_p2) target bundleno = 280 (0x118), region = 32  ;;  %415 = vmatprep.mubr.bf16.mxu0 (!%p139_p2), %v745_v2  ;;  %383 = vmatprep.subr.bf16.mxu0 (!%p139_p2), %v701_v0  ;;  %v704_v3 = vld [vmem:[%s914_s1 + $0x1c] ss:$12 sps:$4 sm:$0xff] (!%p139_p2)   ;;  %v706_v4 = vld [vmem:[%s914_s1 + $0x18] ss:$12 sps:$4 sm:$0xff] (!%p139_p2)  }
   0x7   : > { %384 = vmatpush1.bf16.msra.mxu0 (!%p139_p2), %v703_v1  ;;  %v707_v5 = vld [vmem:[%s914_s1 + $0x34] ss:$12 sps:$4 sm:$0xff] (!%p139_p2)   ;;  %p164_p3 = scmp.lt.s32.totalorder (!%p139_p2), %s163_s16, 13  ;;  %v709_v7 = vld [vmem:[%s914_s1 + $0x30] ss:$12 sps:$4 sm:$0xff] (!%p139_p2)   ;;  %v219_v30 = vshrl.u32 (!%p139_p2), %v218_v29, 7 }
   0x8   : > { %385 = vmatprep.subr.bf16.mxu0 (!%p139_p2), %v704_v3  ;;  %v710_v6 = vld [vmem:[%s914_s1 + $0x8] ss:$12 sps:$4 sm:$0xff] (!%p139_p2)   ;;  %v714_v8 = vld [vmem:[%s914_s1 + $0x20] ss:$12 sps:$4 sm:$0xff] (!%p139_p2)   ;;  %v718_v10 = vld [vmem:[%s914_s1 + $0x38] ss:$12 sps:$4 sm:$0xff] (!%p139_p2)  }
   0x9   : > { %667 = vmatprep.subr.bf16.mxu1 (!%p139_p2), %v710_v6  ;;  %v711_v9 = vld [vmem:[%s914_s1 + $0x4c] ss:$12 sps:$4 sm:$0xff] (!%p139_p2)   ;;  %v713_v11 = vld [vmem:[%s914_s1 + $0x48] ss:$12 sps:$4 sm:$0xff] (!%p139_p2)   ;;  %v715_v12 = vld [vmem:[%s914_s1 + $0x64] ss:$12 sps:$4 sm:$0xff] (!%p139_p2)  }
   0xa   : > { %668 = vmatpush3.bf16.msra.mxu1 (!%p139_p2), %v710_v6  ;;  %v722_v13 = vld [vmem:[%s914_s1 + $0x50] ss:$12 sps:$4 sm:$0xff] (!%p139_p2)   ;;  %v717_v14 = vld [vmem:[%s914_s1 + $0x60] ss:$12 sps:$4 sm:$0xff] (!%p139_p2)   ;;  %v726_v16 = vld [vmem:[%s914_s1 + $0x68] ss:$12 sps:$4 sm:$0xff] (!%p139_p2)  }
   0xb   : > { %386 = vmatpush1.bf16.msra.mxu0 (!%p139_p2), %v706_v4  ;;  %669 = vmatprep.subr.bf16.mxu1 (!%p139_p2), %v714_v8  ;;  %v719_v15 = vld [vmem:[%s914_s1 + $0x7c] ss:$12 sps:$4 sm:$0xff] (!%p139_p2)   ;;  %v721_v17 = vld [vmem:[%s914_s1 + $0x78] ss:$12 sps:$4 sm:$0xff] (!%p139_p2)   ;;  %v723_v18 = vld [vmem:[%s914_s1 + $0x94] ss:$12 sps:$4 sm:$0xff] (!%p139_p2)  }
   0xc   : > { %387 = vmatprep.subr.bf16.mxu0 (!%p139_p2), %v707_v5  ;;  %v730_v20 = vld [vmem:[%s914_s1 + $0x80] ss:$12 sps:$4 sm:$0xff] (!%p139_p2)   ;;  %v725_v21 = vld [vmem:[%s914_s1 + $0x90] ss:$12 sps:$4 sm:$0xff] (!%p139_p2)   ;;  %v732_v23 = vld [vmem:[%s914_s1 + $0x98] ss:$12 sps:$4 sm:$0xff] (!%p139_p2)  }
   0xd   : > { %s918_s16 = smov (!%p164_p3, %s163_s16), 13  ;;  %v727_v22 = vld [vmem:[%s914_s1 + $0xac] ss:$12 sps:$4 sm:$0xff]   ;;  %v729_v24 = vld [vmem:[%s914_s1 + $0xa8] ss:$12 sps:$4 sm:$0xff]   ;;  %v220_v31 = vsub.s32 0, %v219_v30 }
   0xe   : > { %670 = vmatpush3.bf16.msra.mxu1 %v714_v8  ;;  %s623_s15 = sshll.u32 %s918_s16, 2  ;;  %v733_v25 = vld [vmem:[%s914_s1 + $0xb0] ss:$12 sps:$4 sm:$0xff]   ;;  %v216_v32 = vld [vmem:[%s915_s2] sm:$0x7]  ;;  %v224_v33 = vsub.s32 1, %v219_v30 }
   0xf   : > { %388 = vmatpush1.bf16.msra.mxu0 %v709_v7  ;;  %671 = vmatprep.subr.bf16.mxu1 %v718_v10  ;;  %s826_s23 = scalar_lea.vmem %s913_s0, %s623_s15  ;;  %v865_v34 = vrot.slane %v216_v32, %v220_v31  ;;  %v228_v35 = vsub.s32 2, %v219_v30  ;;  %s691_s19 = smul.u32 24, %s918_s16 }
  0x10   : > { %389 = vmatprep.subr.bf16.mxu0 %v711_v9  ;;  %v731_v19 = vld [vmem:[%s826_s23] sm:$0xff]   ;;  %v734_v26 = vld [vmem:[%s826_s23 + $0x8] sm:$0xff]   ;;  %v735_v27 = vld [vmem:[%s826_s23 + $0x10] sm:$0xff]   ;;  %v868_v36 = vrot.slane %v216_v32, %v224_v33 }
  0x11   : > { %683 = vmatprep.mubr.bf16.mxu1 %v731_v19  ;;  %v736_v28 = vld [vmem:[%s826_s23 + $0x18] ss:$0 sps:$4 sm:$0xff]   ;;  %v229_v40 = vrot.slane %v216_v32, %v228_v35  ;;  %s874_s22 = scalar_lea.vmem %s916_s3, %s691_s19 }
  0x12   : > { %672 = vmatpush3.bf16.msra.mxu1 %v718_v10 }
  0x13   : > { %390 = vmatpush1.bf16.msra.mxu0 %v713_v11  ;;  %673 = vmatprep.subr.bf16.mxu1 %v722_v13 }
  0x14   : > { %391 = vmatprep.subr.bf16.mxu0 %v715_v12 }
  0x16   : > { %674 = vmatpush3.bf16.msra.mxu1 %v722_v13 }
  0x17   : > { %392 = vmatpush1.bf16.msra.mxu0 %v717_v14  ;;  %675 = vmatprep.subr.bf16.mxu1 %v726_v16 }
  0x18   : > { %393 = vmatprep.subr.bf16.mxu0 %v719_v15 }
  0x1a   : > { %676 = vmatpush3.bf16.msra.mxu1 %v726_v16 }
  0x1b   : > { %394 = vmatpush1.bf16.msra.mxu0 %v721_v17  ;;  %677 = vmatprep.subr.bf16.mxu1 %v730_v20 }
  0x1c   : > { %395 = vmatprep.subr.bf16.mxu0 %v723_v18 }
  0x1e   : > { %678 = vmatpush3.bf16.msra.mxu1 %v730_v20 }
  0x1f   : > { %396 = vmatpush1.bf16.msra.mxu0 %v725_v21  ;;  %679 = vmatprep.subr.bf16.mxu1 %v732_v23 }
  0x20   : > { %397 = vmatprep.subr.bf16.mxu0 %v727_v22 }
  0x22   : > { %680 = vmatpush3.bf16.msra.mxu1 %v732_v23 }
  0x23   : > { %398 = vmatpush1.bf16.msra.mxu0 %v729_v24  ;;  %681 = vmatprep.subr.bf16.mxu1 %v733_v25 }
  0x26   : > { %416 = vmatmul.mubr.bf16.vlgmr.msra.gmra.mrb[0].mxu0 %v731_v19  ;;  %682 = vmatpush3.bf16.msra.mxu1 %v733_v25 }
  0x27   : > { %425 = vmatprep.mubr.bf16.mxu0 %v745_v2 }
  0x29   : > { %684 = vmatmul.mubr.bf16.vlgmr.msra.gmra.mrb[0].mxu1 %v734_v26 }
  0x2a   : > { %687 = vmatprep.mubr.bf16.mxu1 %v735_v27 }
  0x2e   : > { %426 = vmatmul.mubr.bf16.gmra.mrb[4].mxu0 %v734_v26 }
  0x2f   : > { %435 = vmatprep.mubr.bf16.mxu0 %v745_v2 }
  0x31   : > { %688 = vmatmul.mubr.bf16.gmra.mrb[4].mxu1 %v736_v28 }
  0x36   : > { %436 = vmatmul.mubr.bf16.gmra.mrb[8].mxu0 %v735_v27 }
  0x37   : > { %445 = vmatprep.mubr.bf16.mxu0 %v745_v2 }
  0x3e   : > { %446 = vmatmul.mubr.bf16.gmra.mrb[12].mxu0 %v736_v28 }
  0xf9   : > { %v417_v37 = vpop.f32.mrb[0].mxu0 }
  0xfa   : > { %v418_v38 = vadd.f32 %v417_v37, %v865_v34  ;;  %v419_v39 = vpop.f32.mrb[1].mxu0 }
  0xfb   : > { %v420_v41 = vadd.f32 %v419_v39, %v868_v36  ;;  %v421_v42 = vpop.f32.mrb[2].mxu0 }
  0xfc   : > { %v518_v43 = vmax.f32 %v418_v38, 0.0  ;;  %v422_v44 = vadd.f32 %v421_v42, %v865_v34  ;;  %v423_v45 = vpop.f32.mrb[3].mxu0  ;;  %v685_v48 = vpop.f32.mrb[0].mxu1 }
  0xfd   : > { %v519_v46 = vmax.f32 %v420_v41, 0.0  ;;  %v424_v47 = vadd.f32 %v423_v45, %v868_v36  ;;  %v497_v50 = vadd.f32 %v685_v48, %v229_v40  ;;  %v488_v51 = vpop.f32.mrb[1].mxu1 }
  0xfe   : > { %539 = vst [vmem:[%s874_s22] sm:$0xff] %v518_v43  ;;  %v521_v49 = vmax.f32 %v422_v44, 0.0  ;;  %v489_v53 = vadd.f32 %v488_v51, %v229_v40  ;;  %v686_v54 = vpop.f32.mrb[2].mxu1 }
  0xff   : > { %540 = vst [vmem:[%s874_s22 + $0x8] sm:$0xff] %v519_v46  ;;  %v522_v52 = vmax.f32 %v424_v47, 0.0  ;;  %v526_v55 = vmax.f32 %v497_v50, 0.0  ;;  %v500_v56 = vadd.f32 %v686_v54, %v229_v40  ;;  %v491_v57 = vpop.f32.mrb[3].mxu1 }
 0x100   : > { %542 = vst [vmem:[%s874_s22 + $0x18] sm:$0xff] %v521_v49  ;;  %v520_v59 = vmax.f32 %v489_v53, 0.0  ;;  %v492_v60 = vadd.f32 %v491_v57, %v229_v40 }
 0x101   : > { %543 = vst [vmem:[%s874_s22 + $0x20] sm:$0xff] %v522_v52  ;;  %v427_v58 = vpop.f32.mrb[4].mxu0  ;;  %547 = vst [vmem:[%s874_s22 + $0x40] sm:$0xff] %v526_v55  ;;  %v529_v63 = vmax.f32 %v500_v56, 0.0 }
 0x102   : > { %v428_v61 = vadd.f32 %v427_v58, %v865_v34  ;;  %v429_v62 = vpop.f32.mrb[5].mxu0  ;;  %541 = vst [vmem:[%s874_s22 + $0x10] sm:$0xff] %v520_v59  ;;  %v523_v2 = vmax.f32 %v492_v60, 0.0 }
 0x103   : > { %v430_v0 = vadd.f32 %v429_v62, %v868_v36  ;;  %v431_v1 = vpop.f32.mrb[6].mxu0  ;;  %550 = vst [vmem:[%s874_s22 + $0x58] sm:$0xff] %v529_v63 }
 0x104   : > { %v524_v3 = vmax.f32 %v428_v61, 0.0  ;;  %v432_v4 = vadd.f32 %v431_v1, %v865_v34  ;;  %v433_v5 = vpop.f32.mrb[7].mxu0  ;;  %544 = vst [vmem:[%s874_s22 + $0x28] sm:$0xff] %v523_v2  ;;  %v689_v8 = vpop.f32.mrb[4].mxu1 }
 0x105   : > { %v525_v6 = vmax.f32 %v430_v0, 0.0  ;;  %v434_v7 = vadd.f32 %v433_v5, %v868_v36  ;;  %v513_v10 = vadd.f32 %v689_v8, %v229_v40  ;;  %v504_v11 = vpop.f32.mrb[5].mxu1 }
 0x106   : > { %545 = vst [vmem:[%s874_s22 + $0x30] sm:$0xff] %v524_v3  ;;  %v527_v9 = vmax.f32 %v432_v4, 0.0  ;;  %v505_v13 = vadd.f32 %v504_v11, %v229_v40  ;;  %v690_v14 = vpop.f32.mrb[6].mxu1 }
 0x107   : > { %546 = vst [vmem:[%s874_s22 + $0x38] sm:$0xff] %v525_v6  ;;  %v528_v12 = vmax.f32 %v434_v7, 0.0  ;;  %v538_v15 = vmax.f32 %v513_v10, 0.0  ;;  %v507_v16 = vpop.f32.mrb[7].mxu1 }
 0x108   : > { %548 = vst [vmem:[%s874_s22 + $0x48] sm:$0xff] %v527_v9  ;;  %v532_v18 = vmax.f32 %v505_v13, 0.0  ;;  %v508_v19 = vadd.f32 %v507_v16, %v229_v40 }
 0x109   : > { %549 = vst [vmem:[%s874_s22 + $0x50] sm:$0xff] %v528_v12  ;;  %v437_v17 = vpop.f32.mrb[8].mxu0  ;;  %559 = vst [vmem:[%s874_s22 + $0xa0] sm:$0xff] %v538_v15 }
 0x10a   : > { %v438_v20 = vadd.f32 %v437_v17, %v865_v34  ;;  %v439_v21 = vpop.f32.mrb[9].mxu0  ;;  %553 = vst [vmem:[%s874_s22 + $0x70] sm:$0xff] %v532_v18  ;;  %v535_v24 = vmax.f32 %v508_v19, 0.0 }
 0x10b   : > { %v440_v22 = vadd.f32 %v439_v21, %v868_v36  ;;  %v441_v23 = vpop.f32.mrb[10].mxu0 }
 0x10c   : > { %v530_v25 = vmax.f32 %v438_v20, 0.0  ;;  %v442_v26 = vadd.f32 %v441_v23, %v865_v34  ;;  %v443_v27 = vpop.f32.mrb[11].mxu0  ;;  %556 = vst [vmem:[%s874_s22 + $0x88] sm:$0xff] %v535_v24 }
 0x10d   : > { %v531_v28 = vmax.f32 %v440_v22, 0.0  ;;  %v444_v29 = vadd.f32 %v443_v27, %v868_v36 }
 0x10e   : > { %551 = vst [vmem:[%s874_s22 + $0x60] sm:$0xff] %v530_v25  ;;  %v533_v30 = vmax.f32 %v442_v26, 0.0 }
 0x10f   : > { %552 = vst [vmem:[%s874_s22 + $0x68] sm:$0xff] %v531_v28  ;;  %v534_v31 = vmax.f32 %v444_v29, 0.0 }
 0x110   : > { %554 = vst [vmem:[%s874_s22 + $0x78] sm:$0xff] %v533_v30 }
 0x111   : > { %555 = vst [vmem:[%s874_s22 + $0x80] sm:$0xff] %v534_v31  ;;  %v447_v32 = vpop.f32.mrb[12].mxu0 }
 0x112   : > { %v448_v33 = vadd.f32 %v447_v32, %v865_v34  ;;  %v449_v35 = vpop.f32.mrb[13].mxu0 }
 0x113   : > { %v450_v37 = vadd.f32 %v449_v35, %v868_v36  ;;  %v451_v38 = vpop.f32.mrb[14].mxu0 }
 0x114   : > { %v536_v39 = vmax.f32 %v448_v33, 0.0  ;;  %v452_v40 = vpop.f32.mrb[15].mxu0 }
 0x115   : > { %v537_v41 = vmax.f32 %v450_v37, 0.0 }
 0x116   : > { %557 = vst [vmem:[%s874_s22 + $0x90] sm:$0xff] %v536_v39 }
 0x117   : > { %558 = vst [vmem:[%s874_s22 + $0x98] sm:$0xff] %v537_v41 }
 0x118 PF: > { %s13_s12 = sadd.s32 1, %s743_s12  }
 0x119   : > { %p10_p4 = scmp.ge.s32.totalorder %s13_s12, 4  }
 0x11b   :  { %12 = sbr.rel (!%p10_p4) target bundleno = 1 (0x1), region = 62 }

</bundles_post_ra>
